<compile_context>
chip_gen: v7x
topology: tpu7x:2x2x1
jax: 0.10.0
libtpu: 0.0.40
codegen_flags: <defaults>
</compile_context>

<pallas_src>
import functools
import math

import jax
import jax.numpy as jnp
from jax import lax
from jax.experimental import pallas as pl
from jax.experimental.pallas import tpu as pltpu

LN_EPS = 1e-5  # PyTorch nn.LayerNorm default


def _layernorm_f32(x, w, b):
    mu = jnp.mean(x, axis=-1, keepdims=True)
    var = jnp.mean((x - mu) ** 2, axis=-1, keepdims=True)
    return (x - mu) * lax.rsqrt(var + LN_EPS) * w + b


def _causal_mask(L):
    r = lax.broadcasted_iota(jnp.int32, (L, L), 0)
    c = lax.broadcasted_iota(jnp.int32, (L, L), 1)
    return jnp.where(c <= r, 0.0, -jnp.inf).astype(jnp.float32)


def _stack_kernel(num_heads, num_layers, causal,
                  x_ref, mask_ref,
                  ln1w_ref, ln1b_ref, wqkv_ref, bqkv_ref, wout_ref, bout_ref,
                  ln2w_ref, ln2b_ref, wfc_ref, bfc_ref, wproj_ref, bproj_ref,
                  ox_ref, op_ref, ctx_ref, cls_ref):
    """One (batch-tile, layer) step of the fused resblock stack."""
    layer = pl.program_id(1)
    B, L, D = x_ref.shape
    BL = B * L
    hd = D // num_heads

    # Seed the resident activation carry (ox_ref has a batch-only index map, so the block
    # stays in VMEM across the arbitrary layer axis) and zero the CLS-prob accumulator.
    @pl.when(layer == 0)
    def _():
        ox_ref[...] = x_ref[...]
        cls_ref[...] = jnp.zeros_like(cls_ref)

    x = ox_ref[...]                                      # (B, L, D) f32, layer input

    # ---- ln_1 + fused QKV in-projection (bf16 MXU, f32 accumulate) --------------------
    # Q columns of w_qkv / b_qkv are pre-scaled by 1/sqrt(head_dim) on the host.
    h = _layernorm_f32(x, ln1w_ref[0], ln1b_ref[0])
    qkv = jnp.dot(h.reshape(BL, D).astype(jnp.bfloat16), wqkv_ref[0],
                  preferred_element_type=jnp.float32) + bqkv_ref[0]     # (B*L, 3D)
    q = qkv[:, :D].reshape(B, L, D)
    k = qkv[:, D:2 * D].reshape(B, L, D)
    v = qkv[:, 2 * D:].reshape(B, L, D)

    if causal:
        mask = mask_ref[...]                             # (L, L) f32, hoisted

    # ---- multi-head attention; per-head contexts assembled in a bf16 VMEM slab --------
    cls_acc = jnp.zeros((B, L), jnp.float32)
    for hh in range(num_heads):
        sl = slice(hh * hd, (hh + 1) * hd)
        qh = q[:, :, sl].astype(jnp.bfloat16)
        kh = k[:, :, sl].astype(jnp.bfloat16)
        vh = v[:, :, sl].astype(jnp.bfloat16)
        s = jnp.einsum("bld,bmd->blm", qh, kh,
                       preferred_element_type=jnp.float32)              # (B, L, L)
        if causal:
            s = s + mask          # safe: causal diagonal is 0 so the row max stays finite
        s = s - jnp.max(s, axis=-1, keepdims=True)
        e = jnp.exp(s)
        inv = 1.0 / jnp.sum(e, axis=-1, keepdims=True)   # exact: probs are exposed output
        p = e * inv
        cls_acc = cls_acc + p[:, 0, :]                   # CLS query row of probabilities
        ctx = jnp.einsum("blm,bmd->bld", p.astype(jnp.bfloat16), vh,
                         preferred_element_type=jnp.float32)            # (B, L, hd)
        ctx_ref[:, sl] = ctx.reshape(BL, hd).astype(jnp.bfloat16)

    # Single full-depth (K = D) output projection over the assembled head slab.
    attn = jnp.dot(ctx_ref[...], wout_ref[0],
                   preferred_element_type=jnp.float32) + bout_ref[0]
    x = x + attn.reshape(B, L, D)                        # residual 1

    # ---- ln_2 + MLP (CLIP QuickGELU: a * sigmoid(1.702 a)) ----------------------------
    h2 = _layernorm_f32(x, ln2w_ref[0], ln2b_ref[0])
    a = jnp.dot(h2.reshape(BL, D).astype(jnp.bfloat16), wfc_ref[0],
                preferred_element_type=jnp.float32) + bfc_ref[0]
    g = (a * jax.nn.sigmoid(1.702 * a)).astype(jnp.bfloat16)
    m = jnp.dot(g, wproj_ref[0], preferred_element_type=jnp.float32) + bproj_ref[0]
    x = x + m.reshape(B, L, D)                           # residual 2

    ox_ref[...] = x
    cls_ref[...] = cls_ref[...] + cls_acc

    # average_attn_weights=True (mean over heads) + mean over layers, CLS row 0.
    # Lane-dense, single write per batch tile.
    # TODO(synk): cls_indices gather path (per-batch CLS row index) not implemented.
    @pl.when(layer == num_layers - 1)
    def _():
        op_ref[...] = (cls_ref[...] * (1.0 / (num_heads * num_layers))).reshape(B, 1, L)


def _vmem_bytes_estimate(B, L, D):
    """Rough per-step VMEM footprint used for tile sizing / vmem_limit."""
    bf16, f32 = 2, 4
    w_layer = 12 * D * D * bf16 + 13 * D * f32           # one layer's weights + LN/biases
    act_io = 4 * B * L * D * f32                         # x in (x2 bufs) + ox out (x2)
    scratch = B * L * D * bf16 + B * L * f32             # ctx slab + cls accumulator
    mask = 2 * L * L * f32
    live = 10 * B * L * D * f32 + 3 * B * L * L * f32    # qkv / mlp / score intermediates
    return 2 * w_layer + act_io + scratch + mask + live + (1 << 20)


def _pick_batch_tile(N, L, D, budget_bytes, max_tile=16):
    best = 1
    for B in range(1, min(N, max_tile) + 1):
        if N % B == 0 and _vmem_bytes_estimate(B, L, D) <= budget_bytes:
            best = B
    return best


def exposed_transformer_forward(x_lnd, params, num_heads, causal=True, batch_tile=None):
    """Reproduces ExposedTransformer.forward(x, cls_indices=None).

    x_lnd: (L, N, D) float32 (batch_first=False, CLIP convention).
    Returns (x (L, N, D) f32, attn_probs (N, L) f32)."""
    L, N, D = x_lnd.shape
    num_layers = params["w_qkv"].shape[0]
    hd = D // num_heads
    scale = 1.0 / math.sqrt(hd)

    # Fold the attention scale into the Q part of the QKV projection (free, done once).
    col_scale = jnp.concatenate([jnp.full((D,), scale, jnp.float32),
                                 jnp.ones((2 * D,), jnp.float32)])
    w_qkv = (params["w_qkv"].astype(jnp.float32) * col_scale).astype(jnp.bfloat16)
    b_qkv = (params["b_qkv"].astype(jnp.float32) * col_scale).astype(jnp.float32)

    # Per-generation VMEM sizing (v7x: 64 MiB/TC, v5e/v6e: 128 MiB).
    try:
        vmem_cap = int(getattr(pltpu.get_tpu_info(), "vmem_capacity_bytes",
                               64 * 1024 * 1024))
    except Exception:
        vmem_cap = 64 * 1024 * 1024                      # conservative fallback
    budget = int(vmem_cap * 0.75)                        # headroom for compiler scratch
    B = batch_tile if batch_tile is not None else _pick_batch_tile(N, L, D, budget)
    assert N % B == 0, (N, B)
    est = _vmem_bytes_estimate(B, L, D)
    vmem_limit = int(min(max(est * 1.3, 32 * 1024 * 1024), vmem_cap * 0.85))

    # Host-side layout transposes kept on purpose (see module docstring).
    x_nld = jnp.transpose(x_lnd, (1, 0, 2)).astype(jnp.float32)       # (N, L, D)
    mask = _causal_mask(L) if causal else jnp.zeros((L, L), jnp.float32)

    def layer_spec(arr):
        zeros = (0,) * (arr.ndim - 1)
        return pl.BlockSpec((1,) + arr.shape[1:],
                            lambda nb, l, _z=zeros: (l,) + _z)

    weight_args = [params["ln1_w"], params["ln1_b"], w_qkv, b_qkv,
                   params["w_out"], params["b_out"],
                   params["ln2_w"], params["ln2_b"],
                   params["w_fc"], params["b_fc"],
                   params["w_proj"], params["b_proj"]]

    # Advisory cost estimate for XLA's scheduler.
    flops = int(N) * num_layers * (24 * L * D * D + 4 * L * L * D)
    transc = int(N) * num_layers * (num_heads * L * L + 4 * L * D + 2 * L)
    w_bytes = sum(int(a.size) * a.dtype.itemsize for a in weight_args)
    bytes_accessed = (N // B) * w_bytes + 2 * N * L * D * 4 + N * L * 4 + L * L * 4

    kernel = functools.partial(_stack_kernel, num_heads, num_layers, causal)
    out_x, out_p = pl.pallas_call(
        kernel,
        out_shape=(jax.ShapeDtypeStruct((N, L, D), jnp.float32),
                   jax.ShapeDtypeStruct((N, 1, L), jnp.float32)),
        grid=(N // B, num_layers),
        in_specs=[pl.BlockSpec((B, L, D), lambda nb, l: (nb, 0, 0)),
                  pl.BlockSpec((L, L), lambda nb, l: (0, 0))]
                 + [layer_spec(a) for a in weight_args],
        out_specs=(pl.BlockSpec((B, L, D), lambda nb, l: (nb, 0, 0)),
                   pl.BlockSpec((B, 1, L), lambda nb, l: (nb, 0, 0))),
        scratch_shapes=[pltpu.VMEM((B * L, D), jnp.bfloat16),   # per-head ctx slab
                        pltpu.VMEM((B, L), jnp.float32)],       # CLS-prob accumulator
        compiler_params=pltpu.CompilerParams(
            dimension_semantics=("parallel", "arbitrary"),
            vmem_limit_bytes=vmem_limit),
        cost_estimate=pl.CostEstimate(flops=flops, transcendentals=transc,
                                      bytes_accessed=int(bytes_accessed)),
    )(x_nld, mask, *weight_args)

    return jnp.transpose(out_x, (1, 0, 2)), out_p[:, 0, :]


def exposed_transformer_ref(x_lnd, P, num_heads, causal=True):
    """Pure-JAX f32 reference (same bf16-quantized weights, f32 math)."""
    L, N, D = x_lnd.shape
    layers = P["w_qkv"].shape[0]
    hd = D // num_heads
    scale = 1.0 / float(hd) ** 0.5
    x = jnp.transpose(x_lnd, (1, 0, 2)).astype(jnp.float32)
    mask = _causal_mask(L) if causal else jnp.zeros((L, L), jnp.float32)
    cls_rows = []
    for l in range(layers):
        h = _layernorm_f32(x, P["ln1_w"][l, 0], P["ln1_b"][l, 0])
        qkv = h @ P["w_qkv"][l].astype(jnp.float32) + P["b_qkv"][l, 0]
        q, k, v = jnp.split(qkv, 3, axis=-1)
        heads = lambda t: t.reshape(N, L, num_heads, hd).transpose(0, 2, 1, 3)
        qh, kh, vh = heads(q), heads(k), heads(v)
        s = jnp.einsum("nhld,nhmd->nhlm", qh * scale, kh) + mask
        p = jax.nn.softmax(s, axis=-1)
        ctx = jnp.einsum("nhlm,nhmd->nhld", p, vh).transpose(0, 2, 1, 3).reshape(N, L, D)
        x = x + ctx @ P["w_out"][l].astype(jnp.float32) + P["b_out"][l, 0]
        h2 = _layernorm_f32(x, P["ln2_w"][l, 0], P["ln2_b"][l, 0])
        a = h2 @ P["w_fc"][l].astype(jnp.float32) + P["b_fc"][l, 0]
        g = a * jax.nn.sigmoid(1.702 * a)
        x = x + g @ P["w_proj"][l].astype(jnp.float32) + P["b_proj"][l, 0]
        cls_rows.append(p.mean(axis=1)[:, 0, :])
    return jnp.transpose(x, (1, 0, 2)), jnp.mean(jnp.stack(cls_rows, 0), 0)


def init_params(key, layers, width):
    """Deterministic synthetic weights (bf16 matmul weights, f32 LN/biases)."""
    D = width
    std = D ** -0.5
    ks = jax.random.split(key, 8)
    nrm = lambda k, shape, s: jax.random.normal(k, shape) * s
    return dict(
        ln1_w=jnp.ones((layers, 1, D), jnp.float32),
        ln1_b=jnp.zeros((layers, 1, D), jnp.float32),
        w_qkv=nrm(ks[0], (layers, D, 3 * D), std).astype(jnp.bfloat16),
        b_qkv=nrm(ks[1], (layers, 1, 3 * D), 0.02).astype(jnp.float32),
        w_out=nrm(ks[2], (layers, D, D), std).astype(jnp.bfloat16),
        b_out=nrm(ks[3], (layers, 1, D), 0.02).astype(jnp.float32),
        ln2_w=jnp.ones((layers, 1, D), jnp.float32),
        ln2_b=jnp.zeros((layers, 1, D), jnp.float32),
        w_fc=nrm(ks[4], (layers, D, 4 * D), std).astype(jnp.bfloat16),
        b_fc=nrm(ks[5], (layers, 1, 4 * D), 0.02).astype(jnp.float32),
        w_proj=nrm(ks[6], (layers, 4 * D, D), std).astype(jnp.bfloat16),
        b_proj=nrm(ks[7], (layers, 1, D), 0.02).astype(jnp.float32),
    )


if __name__ == "__main__":
    L, N, D, HEADS, LAYERS = 8, 2, 32, 4, 2
    key = jax.random.PRNGKey(0)
    kx, kp = jax.random.split(key)
    x = jax.random.normal(kx, (L, N, D), dtype=jnp.float32)   # (seq, batch, width)
    params = init_params(kp, LAYERS, D)

    out_x, attn_probs = exposed_transformer_forward(x, params, HEADS)
    out_x, attn_probs = jax.block_until_ready((out_x, attn_probs))

    assert out_x.shape == (L, N, D), out_x.shape
    assert attn_probs.shape == (N, L), attn_probs.shape
    assert out_x.dtype == jnp.float32 and attn_probs.dtype == jnp.float32

    # Correctness: compare against a pure-JAX f32 reference (kernel uses bf16 MXU
    # operands, hence loose tolerances on activations).
    ref_x, ref_p = exposed_transformer_ref(x, params, HEADS)
    assert jnp.allclose(jnp.sum(attn_probs, axis=-1), 1.0, atol=1e-3)
    assert jnp.allclose(attn_probs, ref_p, atol=5e-3), \
        float(jnp.max(jnp.abs(attn_probs - ref_p)))
    assert jnp.allclose(out_x, ref_x, atol=5e-2, rtol=5e-2), \
        float(jnp.max(jnp.abs(out_x - ref_x)))
    print("KERNEL_OK")
</pallas_src>

<mosaic_0001>
module attributes {stable_mosaic.version = 11 : i64} {
  func.func @_stack_kernel(%arg0: i32, %arg1: i32, %arg2: memref<2x8x32xf32, #tpu.memory_space<vmem>>, %arg3: memref<8x8xf32, #tpu.memory_space<vmem>>, %arg4: memref<1x1x32xf32, #tpu.memory_space<vmem>>, %arg5: memref<1x1x32xf32, #tpu.memory_space<vmem>>, %arg6: memref<1x32x96xbf16, #tpu.memory_space<vmem>>, %arg7: memref<1x1x96xf32, #tpu.memory_space<vmem>>, %arg8: memref<1x32x32xbf16, #tpu.memory_space<vmem>>, %arg9: memref<1x1x32xf32, #tpu.memory_space<vmem>>, %arg10: memref<1x1x32xf32, #tpu.memory_space<vmem>>, %arg11: memref<1x1x32xf32, #tpu.memory_space<vmem>>, %arg12: memref<1x32x128xbf16, #tpu.memory_space<vmem>>, %arg13: memref<1x1x128xf32, #tpu.memory_space<vmem>>, %arg14: memref<1x128x32xbf16, #tpu.memory_space<vmem>>, %arg15: memref<1x1x32xf32, #tpu.memory_space<vmem>>, %arg16: memref<2x8x32xf32, #tpu.memory_space<vmem>>, %arg17: memref<2x1x8xf32, #tpu.memory_space<vmem>>, %arg18: memref<16x32xbf16, #tpu.memory_space<vmem>>, %arg19: memref<2x8xf32, #tpu.memory_space<vmem>>) attributes {dimension_semantics = [#tpu.dimension_semantics<parallel>, #tpu.dimension_semantics<arbitrary>], iteration_bounds = array<i64: 1, 2>, scalar_prefetch = 0 : i64, scratch_operands = 2 : i64, tpu.core_type = #tpu.core_type<tc>, window_params = [{transform_indices = @transform_0, window_bounds = array<i64: 2, 8, 32>}, {pipeline_mode = #tpu.pipeline_mode<synchronous>, transform_indices = @transform_1, window_bounds = array<i64: 8, 8>}, {transform_indices = @transform_2, window_bounds = array<i64: 1, 1, 32>}, {transform_indices = @transform_3, window_bounds = array<i64: 1, 1, 32>}, {transform_indices = @transform_4, window_bounds = array<i64: 1, 32, 96>}, {transform_indices = @transform_5, window_bounds = array<i64: 1, 1, 96>}, {transform_indices = @transform_6, window_bounds = array<i64: 1, 32, 32>}, {transform_indices = @transform_7, window_bounds = array<i64: 1, 1, 32>}, {transform_indices = @transform_8, window_bounds = array<i64: 1, 1, 32>}, {transform_indices = @transform_9, window_bounds = array<i64: 1, 1, 32>}, {transform_indices = @transform_10, window_bounds = array<i64: 1, 32, 128>}, {transform_indices = @transform_11, window_bounds = array<i64: 1, 1, 128>}, {transform_indices = @transform_12, window_bounds = array<i64: 1, 128, 32>}, {transform_indices = @transform_13, window_bounds = array<i64: 1, 1, 32>}, {transform_indices = @transform_14, window_bounds = array<i64: 2, 8, 32>}, {transform_indices = @transform_15, window_bounds = array<i64: 2, 1, 8>}]} {
    %c0_i32 = arith.constant 0 : i32
    %0 = arith.cmpi eq, %arg1, %c0_i32 : i32
    %1 = arith.extui %0 : i1 to i32
    %c0_i32_0 = arith.constant 0 : i32
    %2 = arith.cmpi ne, %1, %c0_i32_0 : i32
    scf.if %2 {
      %c0_92 = arith.constant 0 : index
      %c0_93 = arith.constant 0 : index
      %c0_94 = arith.constant 0 : index
      %237 = vector.load %arg2[%c0_92, %c0_93, %c0_94] : memref<2x8x32xf32, #tpu.memory_space<vmem>>, vector<2x8x32xf32>
      %c0_95 = arith.constant 0 : index
      %c0_96 = arith.constant 0 : index
      %c0_97 = arith.constant 0 : index
      %238 = vector.load %arg16[%c0_95, %c0_96, %c0_97] : memref<2x8x32xf32, #tpu.memory_space<vmem>>, vector<2x8x32xf32>
      tpu.vector_store %arg16[%c0_95, %c0_96, %c0_97], %237 {strides = array<i32>} : memref<2x8x32xf32, #tpu.memory_space<vmem>>, vector<2x8x32xf32>,
      %cst_98 = arith.constant 0.000000e+00 : f32
      %239 = vector.broadcast %cst_98 : f32 to vector<2x8xf32>
      %c0_99 = arith.constant 0 : index
      %c0_100 = arith.constant 0 : index
      %240 = vector.load %arg19[%c0_99, %c0_100] : memref<2x8xf32, #tpu.memory_space<vmem>>, vector<2x8xf32>
      tpu.vector_store %arg19[%c0_99, %c0_100], %239 {strides = array<i32>} : memref<2x8xf32, #tpu.memory_space<vmem>>, vector<2x8xf32>,
    } else {
    }
    %c0 = arith.constant 0 : index
    %c0_1 = arith.constant 0 : index
    %c0_2 = arith.constant 0 : index
    %3 = vector.load %arg16[%c0, %c0_1, %c0_2] : memref<2x8x32xf32, #tpu.memory_space<vmem>>, vector<2x8x32xf32>
    %c0_3 = arith.constant 0 : index
    %c0_4 = arith.constant 0 : index
    %c0_5 = arith.constant 0 : index
    %4 = vector.load %arg4[%c0_3, %c0_4, %c0_5] : memref<1x1x32xf32, #tpu.memory_space<vmem>>, vector<1x1x32xf32>
    %5 = vector.shape_cast %4 : vector<1x1x32xf32> to vector<1x32xf32>
    %c0_6 = arith.constant 0 : index
    %c0_7 = arith.constant 0 : index
    %c0_8 = arith.constant 0 : index
    %6 = vector.load %arg5[%c0_6, %c0_7, %c0_8] : memref<1x1x32xf32, #tpu.memory_space<vmem>>, vector<1x1x32xf32>
    %7 = vector.shape_cast %6 : vector<1x1x32xf32> to vector<1x32xf32>
    %cst = arith.constant dense<0.000000e+00> : vector<2x8xf32>
    %8 = vector.multi_reduction <add>, %3, %cst [2] : vector<2x8x32xf32> to vector<2x8xf32>
    %9 = vector.shape_cast %8 : vector<2x8xf32> to vector<2x8x1xf32>
    %cst_9 = arith.constant 3.200000e+01 : f32
    %10 = vector.broadcast %cst_9 : f32 to vector<2x8x1xf32>
    %11 = arith.divf %9, %10 : vector<2x8x1xf32>
    %12 = vector.broadcast %11 : vector<2x8x1xf32> to vector<2x8x32xf32>
    %13 = arith.subf %3, %12 : vector<2x8x32xf32>
    %14 = arith.mulf %13, %13 : vector<2x8x32xf32>
    %cst_10 = arith.constant dense<0.000000e+00> : vector<2x8xf32>
    %15 = vector.multi_reduction <add>, %14, %cst_10 [2] : vector<2x8x32xf32> to vector<2x8xf32>
    %16 = vector.shape_cast %15 : vector<2x8xf32> to vector<2x8x1xf32>
    %cst_11 = arith.constant 3.200000e+01 : f32
    %17 = vector.broadcast %cst_11 : f32 to vector<2x8x1xf32>
    %18 = arith.divf %16, %17 : vector<2x8x1xf32>
    %19 = vector.broadcast %11 : vector<2x8x1xf32> to vector<2x8x32xf32>
    %20 = arith.subf %3, %19 : vector<2x8x32xf32>
    %cst_12 = arith.constant 9.99999974E-6 : f32
    %21 = vector.broadcast %cst_12 : f32 to vector<2x8x1xf32>
    %22 = arith.addf %18, %21 : vector<2x8x1xf32>
    %23 = math.rsqrt %22 : vector<2x8x1xf32>
    %24 = vector.broadcast %23 : vector<2x8x1xf32> to vector<2x8x32xf32>
    %25 = arith.mulf %20, %24 : vector<2x8x32xf32>
    %26 = vector.shape_cast %5 : vector<1x32xf32> to vector<1x1x32xf32>
    %27 = vector.broadcast %26 : vector<1x1x32xf32> to vector<2x8x32xf32>
    %28 = arith.mulf %25, %27 : vector<2x8x32xf32>
    %29 = vector.shape_cast %7 : vector<1x32xf32> to vector<1x1x32xf32>
    %30 = vector.broadcast %29 : vector<1x1x32xf32> to vector<2x8x32xf32>
    %31 = arith.addf %28, %30 : vector<2x8x32xf32>
    %32 = vector.shape_cast %31 : vector<2x8x32xf32> to vector<16x32xf32>
    %33 = arith.truncf %32 : vector<16x32xf32> to vector<16x32xbf16>
    %c0_13 = arith.constant 0 : index
    %c0_14 = arith.constant 0 : index
    %c0_15 = arith.constant 0 : index
    %34 = vector.load %arg6[%c0_13, %c0_14, %c0_15] : memref<1x32x96xbf16, #tpu.memory_space<vmem>>, vector<1x32x96xbf16>
    %35 = vector.shape_cast %34 : vector<1x32x96xbf16> to vector<32x96xbf16>
    %cst_16 = arith.constant dense<0.000000e+00> : vector<16x96xf32>
    %36 = tpu.matmul %33, %35, %cst_16 {dimension_numbers = #tpu.dot_dimension_numbers<[1], [0], [0], [1], [0, 0, 1, 1], [], []>} : vector<16x32xbf16>, vector<32x96xbf16>, vector<16x96xf32> -> vector<16x96xf32>
    %c0_17 = arith.constant 0 : index
    %c0_18 = arith.constant 0 : index
    %c0_19 = arith.constant 0 : index
    %37 = vector.load %arg7[%c0_17, %c0_18, %c0_19] : memref<1x1x96xf32, #tpu.memory_space<vmem>>, vector<1x1x96xf32>
    %38 = vector.shape_cast %37 : vector<1x1x96xf32> to vector<1x96xf32>
    %39 = vector.broadcast %38 : vector<1x96xf32> to vector<16x96xf32>
    %40 = arith.addf %36, %39 : vector<16x96xf32>
    %41 = vector.extract_strided_slice %40 {offsets = [0, 0], sizes = [16, 32], strides = [1, 1]} : vector<16x96xf32> to vector<16x32xf32>
    %42 = vector.shape_cast %41 : vector<16x32xf32> to vector<2x8x32xf32>
    %43 = vector.extract_strided_slice %40 {offsets = [0, 32], sizes = [16, 32], strides = [1, 1]} : vector<16x96xf32> to vector<16x32xf32>
    %44 = vector.shape_cast %43 : vector<16x32xf32> to vector<2x8x32xf32>
    %45 = vector.extract_strided_slice %40 {offsets = [0, 64], sizes = [16, 32], strides = [1, 1]} : vector<16x96xf32> to vector<16x32xf32>
    %46 = vector.shape_cast %45 : vector<16x32xf32> to vector<2x8x32xf32>
    %c0_20 = arith.constant 0 : index
    %c0_21 = arith.constant 0 : index
    %47 = vector.load %arg3[%c0_20, %c0_21] : memref<8x8xf32, #tpu.memory_space<vmem>>, vector<8x8xf32>
    %cst_22 = arith.constant 0.000000e+00 : f32
    %48 = vector.broadcast %cst_22 : f32 to vector<2x8xf32>
    %49 = vector.extract_strided_slice %42 {offsets = [0, 0, 0], sizes = [2, 8, 8], strides = [1, 1, 1]} : vector<2x8x32xf32> to vector<2x8x8xf32>
    %50 = arith.truncf %49 : vector<2x8x8xf32> to vector<2x8x8xbf16>
    %51 = vector.extract_strided_slice %44 {offsets = [0, 0, 0], sizes = [2, 8, 8], strides = [1, 1, 1]} : vector<2x8x32xf32> to vector<2x8x8xf32>
    %52 = arith.truncf %51 : vector<2x8x8xf32> to vector<2x8x8xbf16>
    %53 = vector.extract_strided_slice %46 {offsets = [0, 0, 0], sizes = [2, 8, 8], strides = [1, 1, 1]} : vector<2x8x32xf32> to vector<2x8x8xf32>
    %54 = arith.truncf %53 : vector<2x8x8xf32> to vector<2x8x8xbf16>
    "tpu.trace_start"() <{level = 10 : i32, message = "bld,bmd->blm"}> : () -> ()
    %cst_23 = arith.constant dense<0.000000e+00> : vector<2x8x8xf32>
    %55 = tpu.matmul %50, %52, %cst_23 {dimension_numbers = #tpu.dot_dimension_numbers<[2], [2], [1], [1], [0, 0, 0, 1, 1, 1], [0], [0]>} : vector<2x8x8xbf16>, vector<2x8x8xbf16>, vector<2x8x8xf32> -> vector<2x8x8xf32>
    "tpu.trace_stop"() : () -> ()
    %56 = vector.shape_cast %47 : vector<8x8xf32> to vector<1x8x8xf32>
    %57 = vector.broadcast %56 : vector<1x8x8xf32> to vector<2x8x8xf32>
    %58 = arith.addf %55, %57 : vector<2x8x8xf32>
    %cst_24 = arith.constant dense<0xFF800000> : vector<2x8xf32>
    %59 = vector.multi_reduction <maximumf>, %58, %cst_24 [2] : vector<2x8x8xf32> to vector<2x8xf32>
    %60 = vector.shape_cast %59 : vector<2x8xf32> to vector<2x8x1xf32>
    %61 = vector.broadcast %60 : vector<2x8x1xf32> to vector<2x8x8xf32>
    %62 = arith.subf %58, %61 : vector<2x8x8xf32>
    %63 = math.exp %62 : vector<2x8x8xf32>
    %cst_25 = arith.constant dense<0.000000e+00> : vector<2x8xf32>
    %64 = vector.multi_reduction <add>, %63, %cst_25 [2] : vector<2x8x8xf32> to vector<2x8xf32>
    %65 = vector.shape_cast %64 : vector<2x8xf32> to vector<2x8x1xf32>
    %cst_26 = arith.constant 1.000000e+00 : f32
    %66 = vector.broadcast %cst_26 : f32 to vector<2x8x1xf32>
    %67 = arith.divf %66, %65 : vector<2x8x1xf32>
    %68 = vector.broadcast %67 : vector<2x8x1xf32> to vector<2x8x8xf32>
    %69 = arith.mulf %63, %68 : vector<2x8x8xf32>
    %70 = vector.extract_strided_slice %69 {offsets = [0, 0, 0], sizes = [2, 1, 8], strides = [1, 1, 1]} : vector<2x8x8xf32> to vector<2x1x8xf32>
    %71 = vector.shape_cast %70 : vector<2x1x8xf32> to vector<2x8xf32>
    %72 = arith.addf %48, %71 : vector<2x8xf32>
    %73 = arith.truncf %69 : vector<2x8x8xf32> to vector<2x8x8xbf16>
    "tpu.trace_start"() <{level = 10 : i32, message = "blm,bmd->bld"}> : () -> ()
    %cst_27 = arith.constant dense<0.000000e+00> : vector<2x8x8xf32>
    %74 = tpu.matmul %73, %54, %cst_27 {dimension_numbers = #tpu.dot_dimension_numbers<[2], [1], [1], [2], [0, 0, 0, 1, 1, 2], [0], [0]>} : vector<2x8x8xbf16>, vector<2x8x8xbf16>, vector<2x8x8xf32> -> vector<2x8x8xf32>
    "tpu.trace_stop"() : () -> ()
    %75 = vector.shape_cast %74 : vector<2x8x8xf32> to vector<16x8xf32>
    %76 = arith.truncf %75 : vector<16x8xf32> to vector<16x8xbf16>
    %c0_28 = arith.constant 0 : index
    %c0_29 = arith.constant 0 : index
    %77 = vector.load %arg18[%c0_28, %c0_29] : memref<16x32xbf16, #tpu.memory_space<vmem>>, vector<16x8xbf16>
    tpu.vector_store %arg18[%c0_28, %c0_29], %76 {strides = array<i32>} : memref<16x32xbf16, #tpu.memory_space<vmem>>, vector<16x8xbf16>,
    %78 = vector.extract_strided_slice %42 {offsets = [0, 0, 8], sizes = [2, 8, 8], strides = [1, 1, 1]} : vector<2x8x32xf32> to vector<2x8x8xf32>
    %79 = arith.truncf %78 : vector<2x8x8xf32> to vector<2x8x8xbf16>
    %80 = vector.extract_strided_slice %44 {offsets = [0, 0, 8], sizes = [2, 8, 8], strides = [1, 1, 1]} : vector<2x8x32xf32> to vector<2x8x8xf32>
    %81 = arith.truncf %80 : vector<2x8x8xf32> to vector<2x8x8xbf16>
    %82 = vector.extract_strided_slice %46 {offsets = [0, 0, 8], sizes = [2, 8, 8], strides = [1, 1, 1]} : vector<2x8x32xf32> to vector<2x8x8xf32>
    %83 = arith.truncf %82 : vector<2x8x8xf32> to vector<2x8x8xbf16>
    "tpu.trace_start"() <{level = 10 : i32, message = "bld,bmd->blm"}> : () -> ()
    %cst_30 = arith.constant dense<0.000000e+00> : vector<2x8x8xf32>
    %84 = tpu.matmul %79, %81, %cst_30 {dimension_numbers = #tpu.dot_dimension_numbers<[2], [2], [1], [1], [0, 0, 0, 1, 1, 1], [0], [0]>} : vector<2x8x8xbf16>, vector<2x8x8xbf16>, vector<2x8x8xf32> -> vector<2x8x8xf32>
    "tpu.trace_stop"() : () -> ()
    %85 = vector.shape_cast %47 : vector<8x8xf32> to vector<1x8x8xf32>
    %86 = vector.broadcast %85 : vector<1x8x8xf32> to vector<2x8x8xf32>
    %87 = arith.addf %84, %86 : vector<2x8x8xf32>
    %cst_31 = arith.constant dense<0xFF800000> : vector<2x8xf32>
    %88 = vector.multi_reduction <maximumf>, %87, %cst_31 [2] : vector<2x8x8xf32> to vector<2x8xf32>
    %89 = vector.shape_cast %88 : vector<2x8xf32> to vector<2x8x1xf32>
    %90 = vector.broadcast %89 : vector<2x8x1xf32> to vector<2x8x8xf32>
    %91 = arith.subf %87, %90 : vector<2x8x8xf32>
    %92 = math.exp %91 : vector<2x8x8xf32>
    %cst_32 = arith.constant dense<0.000000e+00> : vector<2x8xf32>
    %93 = vector.multi_reduction <add>, %92, %cst_32 [2] : vector<2x8x8xf32> to vector<2x8xf32>
    %94 = vector.shape_cast %93 : vector<2x8xf32> to vector<2x8x1xf32>
    %cst_33 = arith.constant 1.000000e+00 : f32
    %95 = vector.broadcast %cst_33 : f32 to vector<2x8x1xf32>
    %96 = arith.divf %95, %94 : vector<2x8x1xf32>
    %97 = vector.broadcast %96 : vector<2x8x1xf32> to vector<2x8x8xf32>
    %98 = arith.mulf %92, %97 : vector<2x8x8xf32>
    %99 = vector.extract_strided_slice %98 {offsets = [0, 0, 0], sizes = [2, 1, 8], strides = [1, 1, 1]} : vector<2x8x8xf32> to vector<2x1x8xf32>
    %100 = vector.shape_cast %99 : vector<2x1x8xf32> to vector<2x8xf32>
    %101 = arith.addf %72, %100 : vector<2x8xf32>
    %102 = arith.truncf %98 : vector<2x8x8xf32> to vector<2x8x8xbf16>
    "tpu.trace_start"() <{level = 10 : i32, message = "blm,bmd->bld"}> : () -> ()
    %cst_34 = arith.constant dense<0.000000e+00> : vector<2x8x8xf32>
    %103 = tpu.matmul %102, %83, %cst_34 {dimension_numbers = #tpu.dot_dimension_numbers<[2], [1], [1], [2], [0, 0, 0, 1, 1, 2], [0], [0]>} : vector<2x8x8xbf16>, vector<2x8x8xbf16>, vector<2x8x8xf32> -> vector<2x8x8xf32>
    "tpu.trace_stop"() : () -> ()
    %104 = vector.shape_cast %103 : vector<2x8x8xf32> to vector<16x8xf32>
    %105 = arith.truncf %104 : vector<16x8xf32> to vector<16x8xbf16>
    %c0_35 = arith.constant 0 : index
    %c8 = arith.constant 8 : index
    %106 = vector.load %arg18[%c0_35, %c8] : memref<16x32xbf16, #tpu.memory_space<vmem>>, vector<16x8xbf16>
    tpu.vector_store %arg18[%c0_35, %c8], %105 {strides = array<i32>} : memref<16x32xbf16, #tpu.memory_space<vmem>>, vector<16x8xbf16>,
    %107 = vector.extract_strided_slice %42 {offsets = [0, 0, 16], sizes = [2, 8, 8], strides = [1, 1, 1]} : vector<2x8x32xf32> to vector<2x8x8xf32>
    %108 = arith.truncf %107 : vector<2x8x8xf32> to vector<2x8x8xbf16>
    %109 = vector.extract_strided_slice %44 {offsets = [0, 0, 16], sizes = [2, 8, 8], strides = [1, 1, 1]} : vector<2x8x32xf32> to vector<2x8x8xf32>
    %110 = arith.truncf %109 : vector<2x8x8xf32> to vector<2x8x8xbf16>
    %111 = vector.extract_strided_slice %46 {offsets = [0, 0, 16], sizes = [2, 8, 8], strides = [1, 1, 1]} : vector<2x8x32xf32> to vector<2x8x8xf32>
    %112 = arith.truncf %111 : vector<2x8x8xf32> to vector<2x8x8xbf16>
    "tpu.trace_start"() <{level = 10 : i32, message = "bld,bmd->blm"}> : () -> ()
    %cst_36 = arith.constant dense<0.000000e+00> : vector<2x8x8xf32>
    %113 = tpu.matmul %108, %110, %cst_36 {dimension_numbers = #tpu.dot_dimension_numbers<[2], [2], [1], [1], [0, 0, 0, 1, 1, 1], [0], [0]>} : vector<2x8x8xbf16>, vector<2x8x8xbf16>, vector<2x8x8xf32> -> vector<2x8x8xf32>
    "tpu.trace_stop"() : () -> ()
    %114 = vector.shape_cast %47 : vector<8x8xf32> to vector<1x8x8xf32>
    %115 = vector.broadcast %114 : vector<1x8x8xf32> to vector<2x8x8xf32>
    %116 = arith.addf %113, %115 : vector<2x8x8xf32>
    %cst_37 = arith.constant dense<0xFF800000> : vector<2x8xf32>
    %117 = vector.multi_reduction <maximumf>, %116, %cst_37 [2] : vector<2x8x8xf32> to vector<2x8xf32>
    %118 = vector.shape_cast %117 : vector<2x8xf32> to vector<2x8x1xf32>
    %119 = vector.broadcast %118 : vector<2x8x1xf32> to vector<2x8x8xf32>
    %120 = arith.subf %116, %119 : vector<2x8x8xf32>
    %121 = math.exp %120 : vector<2x8x8xf32>
    %cst_38 = arith.constant dense<0.000000e+00> : vector<2x8xf32>
    %122 = vector.multi_reduction <add>, %121, %cst_38 [2] : vector<2x8x8xf32> to vector<2x8xf32>
    %123 = vector.shape_cast %122 : vector<2x8xf32> to vector<2x8x1xf32>
    %cst_39 = arith.constant 1.000000e+00 : f32
    %124 = vector.broadcast %cst_39 : f32 to vector<2x8x1xf32>
    %125 = arith.divf %124, %123 : vector<2x8x1xf32>
    %126 = vector.broadcast %125 : vector<2x8x1xf32> to vector<2x8x8xf32>
    %127 = arith.mulf %121, %126 : vector<2x8x8xf32>
    %128 = vector.extract_strided_slice %127 {offsets = [0, 0, 0], sizes = [2, 1, 8], strides = [1, 1, 1]} : vector<2x8x8xf32> to vector<2x1x8xf32>
    %129 = vector.shape_cast %128 : vector<2x1x8xf32> to vector<2x8xf32>
    %130 = arith.addf %101, %129 : vector<2x8xf32>
    %131 = arith.truncf %127 : vector<2x8x8xf32> to vector<2x8x8xbf16>
    "tpu.trace_start"() <{level = 10 : i32, message = "blm,bmd->bld"}> : () -> ()
    %cst_40 = arith.constant dense<0.000000e+00> : vector<2x8x8xf32>
    %132 = tpu.matmul %131, %112, %cst_40 {dimension_numbers = #tpu.dot_dimension_numbers<[2], [1], [1], [2], [0, 0, 0, 1, 1, 2], [0], [0]>} : vector<2x8x8xbf16>, vector<2x8x8xbf16>, vector<2x8x8xf32> -> vector<2x8x8xf32>
    "tpu.trace_stop"() : () -> ()
    %133 = vector.shape_cast %132 : vector<2x8x8xf32> to vector<16x8xf32>
    %134 = arith.truncf %133 : vector<16x8xf32> to vector<16x8xbf16>
    %c0_41 = arith.constant 0 : index
    %c16 = arith.constant 16 : index
    %135 = vector.load %arg18[%c0_41, %c16] : memref<16x32xbf16, #tpu.memory_space<vmem>>, vector<16x8xbf16>
    tpu.vector_store %arg18[%c0_41, %c16], %134 {strides = array<i32>} : memref<16x32xbf16, #tpu.memory_space<vmem>>, vector<16x8xbf16>,
    %136 = vector.extract_strided_slice %42 {offsets = [0, 0, 24], sizes = [2, 8, 8], strides = [1, 1, 1]} : vector<2x8x32xf32> to vector<2x8x8xf32>
    %137 = arith.truncf %136 : vector<2x8x8xf32> to vector<2x8x8xbf16>
    %138 = vector.extract_strided_slice %44 {offsets = [0, 0, 24], sizes = [2, 8, 8], strides = [1, 1, 1]} : vector<2x8x32xf32> to vector<2x8x8xf32>
    %139 = arith.truncf %138 : vector<2x8x8xf32> to vector<2x8x8xbf16>
    %140 = vector.extract_strided_slice %46 {offsets = [0, 0, 24], sizes = [2, 8, 8], strides = [1, 1, 1]} : vector<2x8x32xf32> to vector<2x8x8xf32>
    %141 = arith.truncf %140 : vector<2x8x8xf32> to vector<2x8x8xbf16>
    "tpu.trace_start"() <{level = 10 : i32, message = "bld,bmd->blm"}> : () -> ()
    %cst_42 = arith.constant dense<0.000000e+00> : vector<2x8x8xf32>
    %142 = tpu.matmul %137, %139, %cst_42 {dimension_numbers = #tpu.dot_dimension_numbers<[2], [2], [1], [1], [0, 0, 0, 1, 1, 1], [0], [0]>} : vector<2x8x8xbf16>, vector<2x8x8xbf16>, vector<2x8x8xf32> -> vector<2x8x8xf32>
    "tpu.trace_stop"() : () -> ()
    %143 = vector.shape_cast %47 : vector<8x8xf32> to vector<1x8x8xf32>
    %144 = vector.broadcast %143 : vector<1x8x8xf32> to vector<2x8x8xf32>
    %145 = arith.addf %142, %144 : vector<2x8x8xf32>
    %cst_43 = arith.constant dense<0xFF800000> : vector<2x8xf32>
    %146 = vector.multi_reduction <maximumf>, %145, %cst_43 [2] : vector<2x8x8xf32> to vector<2x8xf32>
    %147 = vector.shape_cast %146 : vector<2x8xf32> to vector<2x8x1xf32>
    %148 = vector.broadcast %147 : vector<2x8x1xf32> to vector<2x8x8xf32>
    %149 = arith.subf %145, %148 : vector<2x8x8xf32>
    %150 = math.exp %149 : vector<2x8x8xf32>
    %cst_44 = arith.constant dense<0.000000e+00> : vector<2x8xf32>
    %151 = vector.multi_reduction <add>, %150, %cst_44 [2] : vector<2x8x8xf32> to vector<2x8xf32>
    %152 = vector.shape_cast %151 : vector<2x8xf32> to vector<2x8x1xf32>
    %cst_45 = arith.constant 1.000000e+00 : f32
    %153 = vector.broadcast %cst_45 : f32 to vector<2x8x1xf32>
    %154 = arith.divf %153, %152 : vector<2x8x1xf32>
    %155 = vector.broadcast %154 : vector<2x8x1xf32> to vector<2x8x8xf32>
    %156 = arith.mulf %150, %155 : vector<2x8x8xf32>
    %157 = vector.extract_strided_slice %156 {offsets = [0, 0, 0], sizes = [2, 1, 8], strides = [1, 1, 1]} : vector<2x8x8xf32> to vector<2x1x8xf32>
    %158 = vector.shape_cast %157 : vector<2x1x8xf32> to vector<2x8xf32>
    %159 = arith.addf %130, %158 : vector<2x8xf32>
    %160 = arith.truncf %156 : vector<2x8x8xf32> to vector<2x8x8xbf16>
    "tpu.trace_start"() <{level = 10 : i32, message = "blm,bmd->bld"}> : () -> ()
    %cst_46 = arith.constant dense<0.000000e+00> : vector<2x8x8xf32>
    %161 = tpu.matmul %160, %141, %cst_46 {dimension_numbers = #tpu.dot_dimension_numbers<[2], [1], [1], [2], [0, 0, 0, 1, 1, 2], [0], [0]>} : vector<2x8x8xbf16>, vector<2x8x8xbf16>, vector<2x8x8xf32> -> vector<2x8x8xf32>
    "tpu.trace_stop"() : () -> ()
    %162 = vector.shape_cast %161 : vector<2x8x8xf32> to vector<16x8xf32>
    %163 = arith.truncf %162 : vector<16x8xf32> to vector<16x8xbf16>
    %c0_47 = arith.constant 0 : index
    %c24 = arith.constant 24 : index
    %164 = vector.load %arg18[%c0_47, %c24] : memref<16x32xbf16, #tpu.memory_space<vmem>>, vector<16x8xbf16>
    tpu.vector_store %arg18[%c0_47, %c24], %163 {strides = array<i32>} : memref<16x32xbf16, #tpu.memory_space<vmem>>, vector<16x8xbf16>,
    %c0_48 = arith.constant 0 : index
    %c0_49 = arith.constant 0 : index
    %165 = vector.load %arg18[%c0_48, %c0_49] : memref<16x32xbf16, #tpu.memory_space<vmem>>, vector<16x32xbf16>
    %c0_50 = arith.constant 0 : index
    %c0_51 = arith.constant 0 : index
    %c0_52 = arith.constant 0 : index
    %166 = vector.load %arg8[%c0_50, %c0_51, %c0_52] : memref<1x32x32xbf16, #tpu.memory_space<vmem>>, vector<1x32x32xbf16>
    %167 = vector.shape_cast %166 : vector<1x32x32xbf16> to vector<32x32xbf16>
    %cst_53 = arith.constant dense<0.000000e+00> : vector<16x32xf32>
    %168 = tpu.matmul %165, %167, %cst_53 {dimension_numbers = #tpu.dot_dimension_numbers<[1], [0], [0], [1], [0, 0, 1, 1], [], []>} : vector<16x32xbf16>, vector<32x32xbf16>, vector<16x32xf32> -> vector<16x32xf32>
    %c0_54 = arith.constant 0 : index
    %c0_55 = arith.constant 0 : index
    %c0_56 = arith.constant 0 : index
    %169 = vector.load %arg9[%c0_54, %c0_55, %c0_56] : memref<1x1x32xf32, #tpu.memory_space<vmem>>, vector<1x1x32xf32>
    %170 = vector.shape_cast %169 : vector<1x1x32xf32> to vector<1x32xf32>
    %171 = vector.broadcast %170 : vector<1x32xf32> to vector<16x32xf32>
    %172 = arith.addf %168, %171 : vector<16x32xf32>
    %173 = vector.shape_cast %172 : vector<16x32xf32> to vector<2x8x32xf32>
    %174 = arith.addf %3, %173 : vector<2x8x32xf32>
    %c0_57 = arith.constant 0 : index
    %c0_58 = arith.constant 0 : index
    %c0_59 = arith.constant 0 : index
    %175 = vector.load %arg10[%c0_57, %c0_58, %c0_59] : memref<1x1x32xf32, #tpu.memory_space<vmem>>, vector<1x1x32xf32>
    %176 = vector.shape_cast %175 : vector<1x1x32xf32> to vector<1x32xf32>
    %c0_60 = arith.constant 0 : index
    %c0_61 = arith.constant 0 : index
    %c0_62 = arith.constant 0 : index
    %177 = vector.load %arg11[%c0_60, %c0_61, %c0_62] : memref<1x1x32xf32, #tpu.memory_space<vmem>>, vector<1x1x32xf32>
    %178 = vector.shape_cast %177 : vector<1x1x32xf32> to vector<1x32xf32>
    %cst_63 = arith.constant dense<0.000000e+00> : vector<2x8xf32>
    %179 = vector.multi_reduction <add>, %174, %cst_63 [2] : vector<2x8x32xf32> to vector<2x8xf32>
    %180 = vector.shape_cast %179 : vector<2x8xf32> to vector<2x8x1xf32>
    %cst_64 = arith.constant 3.200000e+01 : f32
    %181 = vector.broadcast %cst_64 : f32 to vector<2x8x1xf32>
    %182 = arith.divf %180, %181 : vector<2x8x1xf32>
    %183 = vector.broadcast %182 : vector<2x8x1xf32> to vector<2x8x32xf32>
    %184 = arith.subf %174, %183 : vector<2x8x32xf32>
    %185 = arith.mulf %184, %184 : vector<2x8x32xf32>
    %cst_65 = arith.constant dense<0.000000e+00> : vector<2x8xf32>
    %186 = vector.multi_reduction <add>, %185, %cst_65 [2] : vector<2x8x32xf32> to vector<2x8xf32>
    %187 = vector.shape_cast %186 : vector<2x8xf32> to vector<2x8x1xf32>
    %cst_66 = arith.constant 3.200000e+01 : f32
    %188 = vector.broadcast %cst_66 : f32 to vector<2x8x1xf32>
    %189 = arith.divf %187, %188 : vector<2x8x1xf32>
    %190 = vector.broadcast %182 : vector<2x8x1xf32> to vector<2x8x32xf32>
    %191 = arith.subf %174, %190 : vector<2x8x32xf32>
    %cst_67 = arith.constant 9.99999974E-6 : f32
    %192 = vector.broadcast %cst_67 : f32 to vector<2x8x1xf32>
    %193 = arith.addf %189, %192 : vector<2x8x1xf32>
    %194 = math.rsqrt %193 : vector<2x8x1xf32>
    %195 = vector.broadcast %194 : vector<2x8x1xf32> to vector<2x8x32xf32>
    %196 = arith.mulf %191, %195 : vector<2x8x32xf32>
    %197 = vector.shape_cast %176 : vector<1x32xf32> to vector<1x1x32xf32>
    %198 = vector.broadcast %197 : vector<1x1x32xf32> to vector<2x8x32xf32>
    %199 = arith.mulf %196, %198 : vector<2x8x32xf32>
    %200 = vector.shape_cast %178 : vector<1x32xf32> to vector<1x1x32xf32>
    %201 = vector.broadcast %200 : vector<1x1x32xf32> to vector<2x8x32xf32>
    %202 = arith.addf %199, %201 : vector<2x8x32xf32>
    %203 = vector.shape_cast %202 : vector<2x8x32xf32> to vector<16x32xf32>
    %204 = arith.truncf %203 : vector<16x32xf32> to vector<16x32xbf16>
    %c0_68 = arith.constant 0 : index
    %c0_69 = arith.constant 0 : index
    %c0_70 = arith.constant 0 : index
    %205 = vector.load %arg12[%c0_68, %c0_69, %c0_70] : memref<1x32x128xbf16, #tpu.memory_space<vmem>>, vector<1x32x128xbf16>
    %206 = vector.shape_cast %205 : vector<1x32x128xbf16> to vector<32x128xbf16>
    %cst_71 = arith.constant dense<0.000000e+00> : vector<16x128xf32>
    %207 = tpu.matmul %204, %206, %cst_71 {dimension_numbers = #tpu.dot_dimension_numbers<[1], [0], [0], [1], [0, 0, 1, 1], [], []>} : vector<16x32xbf16>, vector<32x128xbf16>, vector<16x128xf32> -> vector<16x128xf32>
    %c0_72 = arith.constant 0 : index
    %c0_73 = arith.constant 0 : index
    %c0_74 = arith.constant 0 : index
    %208 = vector.load %arg13[%c0_72, %c0_73, %c0_74] : memref<1x1x128xf32, #tpu.memory_space<vmem>>, vector<1x1x128xf32>
    %209 = vector.shape_cast %208 : vector<1x1x128xf32> to vector<1x128xf32>
    %210 = vector.broadcast %209 : vector<1x128xf32> to vector<16x128xf32>
    %211 = arith.addf %207, %210 : vector<16x128xf32>
    %cst_75 = arith.constant 1.702000e+00 : f32
    %212 = vector.broadcast %cst_75 : f32 to vector<16x128xf32>
    %213 = arith.mulf %212, %211 : vector<16x128xf32>
    %214 = arith.negf %213 : vector<16x128xf32>
    %215 = math.exp %214 : vector<16x128xf32>
    %cst_76 = arith.constant 1.000000e+00 : f32
    %216 = vector.broadcast %cst_76 : f32 to vector<16x128xf32>
    %217 = arith.addf %216, %215 : vector<16x128xf32>
    %218 = arith.divf %216, %217 : vector<16x128xf32>
    %219 = arith.mulf %211, %218 : vector<16x128xf32>
    %220 = arith.truncf %219 : vector<16x128xf32> to vector<16x128xbf16>
    %c0_77 = arith.constant 0 : index
    %c0_78 = arith.constant 0 : index
    %c0_79 = arith.constant 0 : index
    %221 = vector.load %arg14[%c0_77, %c0_78, %c0_79] : memref<1x128x32xbf16, #tpu.memory_space<vmem>>, vector<1x128x32xbf16>
    %222 = vector.shape_cast %221 : vector<1x128x32xbf16> to vector<128x32xbf16>
    %cst_80 = arith.constant dense<0.000000e+00> : vector<16x32xf32>
    %223 = tpu.matmul %220, %222, %cst_80 {dimension_numbers = #tpu.dot_dimension_numbers<[1], [0], [0], [1], [0, 0, 1, 1], [], []>} : vector<16x128xbf16>, vector<128x32xbf16>, vector<16x32xf32> -> vector<16x32xf32>
    %c0_81 = arith.constant 0 : index
    %c0_82 = arith.constant 0 : index
    %c0_83 = arith.constant 0 : index
    %224 = vector.load %arg15[%c0_81, %c0_82, %c0_83] : memref<1x1x32xf32, #tpu.memory_space<vmem>>, vector<1x1x32xf32>
    %225 = vector.shape_cast %224 : vector<1x1x32xf32> to vector<1x32xf32>
    %226 = vector.broadcast %225 : vector<1x32xf32> to vector<16x32xf32>
    %227 = arith.addf %223, %226 : vector<16x32xf32>
    %228 = vector.shape_cast %227 : vector<16x32xf32> to vector<2x8x32xf32>
    %229 = arith.addf %174, %228 : vector<2x8x32xf32>
    %c0_84 = arith.constant 0 : index
    %c0_85 = arith.constant 0 : index
    %c0_86 = arith.constant 0 : index
    %230 = vector.load %arg16[%c0_84, %c0_85, %c0_86] : memref<2x8x32xf32, #tpu.memory_space<vmem>>, vector<2x8x32xf32>
    tpu.vector_store %arg16[%c0_84, %c0_85, %c0_86], %229 {strides = array<i32>} : memref<2x8x32xf32, #tpu.memory_space<vmem>>, vector<2x8x32xf32>,
    %c0_87 = arith.constant 0 : index
    %c0_88 = arith.constant 0 : index
    %231 = vector.load %arg19[%c0_87, %c0_88] : memref<2x8xf32, #tpu.memory_space<vmem>>, vector<2x8xf32>
    %232 = arith.addf %231, %159 : vector<2x8xf32>
    %c0_89 = arith.constant 0 : index
    %c0_90 = arith.constant 0 : index
    %233 = vector.load %arg19[%c0_89, %c0_90] : memref<2x8xf32, #tpu.memory_space<vmem>>, vector<2x8xf32>
    tpu.vector_store %arg19[%c0_89, %c0_90], %232 {strides = array<i32>} : memref<2x8xf32, #tpu.memory_space<vmem>>, vector<2x8xf32>,
    %c1_i32 = arith.constant 1 : i32
    %234 = arith.cmpi eq, %arg1, %c1_i32 : i32
    %235 = arith.extui %234 : i1 to i32
    %c0_i32_91 = arith.constant 0 : i32
    %236 = arith.cmpi ne, %235, %c0_i32_91 : i32
    scf.if %236 {
      %c0_92 = arith.constant 0 : index
      %c0_93 = arith.constant 0 : index
      %237 = vector.load %arg19[%c0_92, %c0_93] : memref<2x8xf32, #tpu.memory_space<vmem>>, vector<2x8xf32>
      %cst_94 = arith.constant 1.250000e-01 : f32
      %238 = vector.broadcast %cst_94 : f32 to vector<2x8xf32>
      %239 = arith.mulf %237, %238 : vector<2x8xf32>
      %240 = vector.shape_cast %239 : vector<2x8xf32> to vector<2x1x8xf32>
      %c0_95 = arith.constant 0 : index
      %c0_96 = arith.constant 0 : index
      %c0_97 = arith.constant 0 : index
      %241 = vector.load %arg17[%c0_95, %c0_96, %c0_97] : memref<2x1x8xf32, #tpu.memory_space<vmem>>, vector<2x1x8xf32>
      tpu.vector_store %arg17[%c0_95, %c0_96, %c0_97], %240 {strides = array<i32>} : memref<2x1x8xf32, #tpu.memory_space<vmem>>, vector<2x1x8xf32>,
    } else {
    }
    return
  }
  func.func @transform_0(%arg0: i32, %arg1: i32) -> (i32, i32, i32) {
    %c0_i32 = arith.constant 0 : i32
    %c0_i32_0 = arith.constant 0 : i32
    %c0_i32_1 = arith.constant 0 : i32
    return %arg0, %c0_i32, %c0_i32_0 : i32, i32, i32
  }
  func.func @transform_1(%arg0: i32, %arg1: i32) -> (i32, i32) {
    %c0_i32 = arith.constant 0 : i32
    %c0_i32_0 = arith.constant 0 : i32
    %c0_i32_1 = arith.constant 0 : i32
    return %c0_i32, %c0_i32_0 : i32, i32
  }
  func.func @transform_2(%arg0: i32, %arg1: i32) -> (i32, i32, i32) {
    %c0_i32 = arith.constant 0 : i32
    %c0_i32_0 = arith.constant 0 : i32
    %c0_i32_1 = arith.constant 0 : i32
    return %arg1, %c0_i32, %c0_i32_0 : i32, i32, i32
  }
  func.func @transform_3(%arg0: i32, %arg1: i32) -> (i32, i32, i32) {
    %c0_i32 = arith.constant 0 : i32
    %c0_i32_0 = arith.constant 0 : i32
    %c0_i32_1 = arith.constant 0 : i32
    return %arg1, %c0_i32, %c0_i32_0 : i32, i32, i32
  }
  func.func @transform_4(%arg0: i32, %arg1: i32) -> (i32, i32, i32) {
    %c0_i32 = arith.constant 0 : i32
    %c0_i32_0 = arith.constant 0 : i32
    %c0_i32_1 = arith.constant 0 : i32
    return %arg1, %c0_i32, %c0_i32_0 : i32, i32, i32
  }
  func.func @transform_5(%arg0: i32, %arg1: i32) -> (i32, i32, i32) {
    %c0_i32 = arith.constant 0 : i32
    %c0_i32_0 = arith.constant 0 : i32
    %c0_i32_1 = arith.constant 0 : i32
    return %arg1, %c0_i32, %c0_i32_0 : i32, i32, i32
  }
  func.func @transform_6(%arg0: i32, %arg1: i32) -> (i32, i32, i32) {
    %c0_i32 = arith.constant 0 : i32
    %c0_i32_0 = arith.constant 0 : i32
    %c0_i32_1 = arith.constant 0 : i32
    return %arg1, %c0_i32, %c0_i32_0 : i32, i32, i32
  }
  func.func @transform_7(%arg0: i32, %arg1: i32) -> (i32, i32, i32) {
    %c0_i32 = arith.constant 0 : i32
    %c0_i32_0 = arith.constant 0 : i32
    %c0_i32_1 = arith.constant 0 : i32
    return %arg1, %c0_i32, %c0_i32_0 : i32, i32, i32
  }
  func.func @transform_8(%arg0: i32, %arg1: i32) -> (i32, i32, i32) {
    %c0_i32 = arith.constant 0 : i32
    %c0_i32_0 = arith.constant 0 : i32
    %c0_i32_1 = arith.constant 0 : i32
    return %arg1, %c0_i32, %c0_i32_0 : i32, i32, i32
  }
  func.func @transform_9(%arg0: i32, %arg1: i32) -> (i32, i32, i32) {
    %c0_i32 = arith.constant 0 : i32
    %c0_i32_0 = arith.constant 0 : i32
    %c0_i32_1 = arith.constant 0 : i32
    return %arg1, %c0_i32, %c0_i32_0 : i32, i32, i32
  }
  func.func @transform_10(%arg0: i32, %arg1: i32) -> (i32, i32, i32) {
    %c0_i32 = arith.constant 0 : i32
    %c0_i32_0 = arith.constant 0 : i32
    %c0_i32_1 = arith.constant 0 : i32
    return %arg1, %c0_i32, %c0_i32_0 : i32, i32, i32
  }
  func.func @transform_11(%arg0: i32, %arg1: i32) -> (i32, i32, i32) {
    %c0_i32 = arith.constant 0 : i32
    %c0_i32_0 = arith.constant 0 : i32
    %c0_i32_1 = arith.constant 0 : i32
    return %arg1, %c0_i32, %c0_i32_0 : i32, i32, i32
  }
  func.func @transform_12(%arg0: i32, %arg1: i32) -> (i32, i32, i32) {
    %c0_i32 = arith.constant 0 : i32
    %c0_i32_0 = arith.constant 0 : i32
    %c0_i32_1 = arith.constant 0 : i32
    return %arg1, %c0_i32, %c0_i32_0 : i32, i32, i32
  }
  func.func @transform_13(%arg0: i32, %arg1: i32) -> (i32, i32, i32) {
    %c0_i32 = arith.constant 0 : i32
    %c0_i32_0 = arith.constant 0 : i32
    %c0_i32_1 = arith.constant 0 : i32
    return %arg1, %c0_i32, %c0_i32_0 : i32, i32, i32
  }
  func.func @transform_14(%arg0: i32, %arg1: i32) -> (i32, i32, i32) {
    %c0_i32 = arith.constant 0 : i32
    %c0_i32_0 = arith.constant 0 : i32
    %c0_i32_1 = arith.constant 0 : i32
    return %arg0, %c0_i32, %c0_i32_0 : i32, i32, i32
  }
  func.func @transform_15(%arg0: i32, %arg1: i32) -> (i32, i32, i32) {
    %c0_i32 = arith.constant 0 : i32
    %c0_i32_0 = arith.constant 0 : i32
    %c0_i32_1 = arith.constant 0 : i32
    return %arg0, %c0_i32, %c0_i32_0 : i32, i32, i32
  }
}

</mosaic_0001>

<bundles_post_ra>
// kernel: tpu_custom_call.1
= control target key start
LH: loop header
LB: loop body
LE: loop exit
PB: predicated region body
PF: predicated region fallthrough
CT: control target
= control target key end

     0   :  { %s3318_s0 = inlined_call_operand.vmem [shape: f32[2,8,32], index: 0, kind: input, shape index: {}]   ;;  %s3319_s1 = inlined_call_operand.vmem [shape: f32[8,8], index: 1, kind: input, shape index: {}]   ;;  %s3320_s2 = inlined_call_operand.vmem [shape: f32[2,1,32], index: 2, kind: input, shape index: {}]   ;;  %s3321_s3 = inlined_call_operand.vmem [shape: f32[2,1,32], index: 3, kind: input, shape index: {}]   ;;  %s3322_s4 = inlined_call_operand.vmem [shape: bf16[2,32,96], index: 4, kind: input, shape index: {}]   ;;  %s3323_s5 = inlined_call_operand.vmem [shape: f32[2,1,96], index: 5, kind: input, shape index: {}]   ;;  %s3324_s6 = inlined_call_operand.vmem [shape: bf16[2,32,32], index: 6, kind: input, shape index: {}]   ;;  %s3325_s7 = inlined_call_operand.vmem [shape: f32[2,1,32], index: 7, kind: input, shape index: {}]   ;;  %s3326_s8 = inlined_call_operand.vmem [shape: f32[2,1,32], index: 8, kind: input, shape index: {}]   ;;  %s3327_s9 = inlined_call_operand.vmem [shape: f32[2,1,32], index: 9, kind: input, shape index: {}]   ;;  %s3328_s10 = inlined_call_operand.vmem [shape: bf16[2,32,128], index: 10, kind: input, shape index: {}]   ;;  %s3329_s11 = inlined_call_operand.vmem [shape: f32[2,1,128], index: 11, kind: input, shape index: {}]   ;;  %s3330_s12 = inlined_call_operand.vmem [shape: bf16[2,128,32], index: 12, kind: input, shape index: {}]   ;;  %s3331_s13 = inlined_call_operand.vmem [shape: f32[2,1,32], index: 13, kind: input, shape index: {}]   ;;  %s3332_s14 = inlined_call_operand.hbm [shape: f32[2,8,32], index: 14, kind: output, shape index: {0}]   ;;  %s3333_s15 = inlined_call_operand.hbm [shape: f32[2,1,8], index: 15, kind: output, shape index: {1}]  }
   0x1   :  { %3339 = sst [smem:[#allocation14_spill]] %s3319_s1 }
   0x2   :  { %3340 = sst [smem:[#allocation15_spill]] %s3322_s4 }
   0x3   :  { %3341 = sst [smem:[#allocation16_spill]] %s3324_s6 }
   0x4   :  { %3342 = sst [smem:[#allocation17_spill]] %s3332_s14 }
   0x5   :  { %3343 = sst [smem:[#allocation18_spill]] %s3333_s15 }
   0x6   :  { %21 = vsyncpa [#allocation5], 0 }
   0x7   :  { %22 = vsyncpa [#allocation7], 0  ;;  %s2885_s18 = smov 0   ;;  %s2887_s19 = smov 0  }
   0x8   :  { %s2889_s20 = smov 0  }
   0x9 LB: > { %3344 = sst [smem:[#allocation10_spill]] %s2777_s19  ;;  %s37_s22 = sadd.s32 1, %s2777_s19  ;;  %s2781_s20 = sphi %s2889_s20, %s28_s20   ;;  %s2777_s19 = sphi %s2887_s19, %s3364_s19   ;;  %s2773_s18 = sphi %s2885_s18, %s3363_s18  }
   0xa   : > { %3345 = sst [smem:[#allocation11_spill]] %s2781_s20  ;;  %p38_p0 = scmp.ge.s32.totalorder %s37_s22, 2 }
   0xb   : > { %p2325_p1 = scmp.ge.s32.totalorder %s2781_s20, 1  ;;  %p559_p2 = scmp.lt.s32.totalorder %s2781_s20, 3 }
   0xc   : > { %s3366_s22 = smov (%p38_p0, %s37_s22), 0 }
   0xd   : > { %3346 = sst [smem:[#allocation12_spill]] %s3366_s22  ;;  %p560_p3 = pnand %p2325_p1, %p559_p2 }
   0xf   : > { %563 = sbr.rel (%p560_p3) target bundleno = 4254 (0x109e), region = 76 }
  0x16   : > { %p652_p4 = scmp.lt.s32.totalorder %s2773_s18, 1  ;;  %s3347_s4 = sld [smem:[#allocation15_spill]] }
  0x17   : > { %s3348_s6 = sld [smem:[#allocation16_spill]]  ;;  %p2334_p5 = scmp.ne.s32.totalorder %s2773_s18, 0 }
  0x18   : > { %s2908_s23 = scalar_select %p652_p4, %s2773_s18, 1 }
  0x19   : > { %702 = sbr.rel (%p2334_p5) target bundleno = 32 (0x20), region = 80  ;;  %v703_v0 = vld [vmem:[%s3318_s0] sm:$0xff] (!%p2334_p5)  ;;  %vm705_vm0 = vcmask (!%p2334_p5), 261120   ;;  %v704_v1 = vld [vmem:[%s3318_s0 + $0x8] sm:$0xff] (!%p2334_p5)  ;;  %vm708_vm1 = vcmask (!%p2334_p5), 58368   ;;  %v2783_v2 = vmov (!%p2334_p5), 0.0  }
  0x1a   : > { %s2385_s30 = sshll.u32 %s2908_s23, 4  ;;  %s676_s1 = scalar_lea.vmem %s3326_s8, %s2908_s23  ;;  %706 = vst.msk [vmem:[#allocation4] sm:$0xff] (!%p2334_p5), %vm705_vm0, %v703_v0  ;;  %707 = vst.msk [vmem:[#allocation4 + $0x8] sm:$0xff] (!%p2334_p5), %vm705_vm0, %v704_v1 }
  0x1b   : > { %s679_s21 = scalar_lea.vmem %s3327_s9, %s2908_s23  ;;  %s695_s16 = scalar_lea.vmem %s3331_s13, %s2908_s23  ;;  %709 = vst.msk [vmem:[#allocation3] sm:$0x3] (!%p2334_p5), %vm708_vm1, %v2783_v2 }
  0x1c   : > { %s2926_s22 = scalar_lea.vmem %s3347_s4, %s2385_s30  ;;  %s2948_s4 = scalar_lea.vmem %s3328_s10, %s2385_s30 }
  0x1d   : > { %s2931_s14 = scalar_lea.vmem %s3348_s6, %s2385_s30  ;;  %s687_s6 = scalar_lea.vmem %s3329_s11, %s2908_s23 }
  0x1e   : > { %3349 = sst [smem:[#allocation13_spill]] %s2931_s14  ;;  %s2388_s14 = sshll.u32 %s2908_s23, 6 }
  0x1f   : > { %s2958_s27 = scalar_lea.vmem %s3330_s12, %s2388_s14 }
  0x20 PF: > { %vm714_vm2 = vcmask 261120   ;;  %v2637_v17 = vld [vmem:[%s2926_s22] sm:$0xff]   ;;  %v2784_v18 = vmov 0.0   ;;  %v2638_v19 = vld [vmem:[%s2926_s22 + $0x8] sm:$0xff]   ;;  %vm2785_vm3 = vmmov 0   ;;  %s3350_s15 = scalar_lea.vmem %s3320_s2, %s2908_s23  ;;  %s3351_s26 = scalar_lea.vmem %s3321_s3, %s2908_s23  ;;  %vm832_vm4 = vcmask 64512  }
  0x21   : > { %v2971_v3 = vld [vmem:[#allocation4] sm:$0xff]  ;;  %v2973_v4 = vld [vmem:[#allocation4 + $0x8] sm:$0xff]  ;;  %2439 = vmatprep.subr.bf16.mxu0 %v2784_v18  ;;  %2459 = vmatprep.subr.bf16.mxu1 %v2784_v18  ;;  %v2335_v28 = vld [vmem:[%s3350_s15] ss:$0 sm:$0xff]  ;;  %s3352_s17 = scalar_lea.vmem %s3323_s5, %s2908_s23  ;;  %s2786_s30 = smov 96   ;;  %vm961_vm5 = vcmask 1043456  }
  0x22   : > { %v715_v5 = vsel %vm714_vm2, %v2971_v3, 0.0  ;;  %v718_v6 = vsel %vm714_vm2, %v2973_v4, 0.0  ;;  %2440 = vmatpush3.bf16.msra.mxu0 %v2637_v17  ;;  %2443 = vmatprep.mubr.msk.bf16.mxu0 %vm2785_vm3, %v2784_v18  ;;  %v2336_v32 = vld [vmem:[%s3351_s26] ss:$0 sm:$0xff]  ;;  %s3353_s14 = sld [smem:[#allocation14_spill]]  ;;  %s2787_s22 = smov 64  }
  0x23   : > { %716 = vadd.xlane.f32.xlu0 %v715_v5  ;;  %2441 = vmatprep.subr.bf16.mxu0 %v2784_v18  ;;  %v2337_v37 = vld [vmem:[%s3352_s17] ss:$0 sm:$0xff]  ;;  %s2788_s15 = smov 88   ;;  %s2789_s19 = smov 120   ;;  %vm1284_vm6 = vcmask 130112   ;;  %vm1515_vm7 = vcmask 195712  }
  0x24   : > { %2461 = vmatprep.mubr.msk.bf16.mxu1 %vm2785_vm3, %v2784_v18  ;;  %s2790_s20 = smov 56   ;;  %s2791_s26 = smov 80   ;;  %vm2067_vm8 = vcmask 1041409   ;;  %vm2071_vm9 = vcmask 58368   ;;  %vm1746_vm10 = vcmask 261312  }
  0x25   : > { %s2792_s29 = smov 112   ;;  %s2793_s28 = smov 48  }
  0x26   : > { %2442 = vmatpush3.bf16.msra.mxu0 %v2638_v19  ;;  %s2794_s17 = smov 72   ;;  %s2796_s24 = smov 40  }
  0x27   : > { %719 = vadd.xlane.f32.xlu0 %v718_v6  ;;  %2447 = vmatprep.subr.bf16.mxu0 %v2784_v18  ;;  %s2797_s25 = smov 8   ;;  %p2378_p6 = scmp.ne.s32.totalorder %s2773_s18, 1 }
  0x28   : > { %v3032_v50 = vld [vmem:[%s3353_s14] sm:$0xff]  ;;  %s2798_s14 = smov 16   ;;  %vm2104_vm11 = vcmask (!%p2378_p6), 57344  }
  0xb0   : > { %v717_v7 = vpop.xlane.xlu0 %716 }
  0xb1   : > { %v722_v8 = vmul.f32 0.03125, %v717_v7 }
  0xb3   : > { %v724_v9 = vsub.f32 %v2971_v3, %v722_v8 }
  0xb4   : > { %v720_v10 = vpop.xlane.xlu0 %719 }
  0xb5   : > { %v723_v11 = vmul.f32 0.03125, %v720_v10  ;;  %v726_v12 = vmul.f32 %v724_v9, %v724_v9 }
  0xb7   : > { %v725_v13 = vsub.f32 %v2973_v4, %v723_v11  ;;  %v728_v14 = vsel %vm714_vm2, %v726_v12, 0.0 }
  0xb8   : > { %729 = vadd.xlane.f32.xlu1 %v728_v14 }
  0xb9   : > { %v727_v15 = vmul.f32 %v725_v13, %v725_v13 }
  0xbb   : > { %v731_v16 = vsel %vm714_vm2, %v727_v15, 0.0 }
  0xbc   : > { %732 = vadd.xlane.f32.xlu1 %v731_v16 }
 0x145   : > { %v730_v20 = vpop.xlane.xlu1 %729 }
 0x146   : > { %v734_v21 = vmul.f32 0.03125, %v730_v20 }
 0x148   : > { %v736_v22 = vadd.f32 1e-05, %v734_v21 }
 0x149   : > { %v733_v23 = vpop.xlane.xlu1 %732 }
 0x14a   : > { %2651 = vrsqrt.f32 %v736_v22  ;;  %v735_v24 = vmul.f32 0.03125, %v733_v23 }
 0x14c   : > { %v737_v25 = vadd.f32 1e-05, %v735_v24 }
 0x14e   : > { %2653 = vrsqrt.f32 %v737_v25 }
 0x154   : > { %v2652_v26 = vpop.eup %2651 }
 0x155   : > { %v740_v27 = vmul.f32 %v2652_v26, %v724_v9 }
 0x157   : > { %v748_v31 = vmul.f32 %v2335_v28, %v740_v27 }
 0x158   : > { %v2654_v29 = vpop.eup %2653 }
 0x159   : > { %v741_v30 = vmul.f32 %v2654_v29, %v725_v13  ;;  %v756_v34 = vadd.f32 %v2336_v32, %v748_v31 }
 0x15b   : > { %v749_v33 = vmul.f32 %v2335_v28, %v741_v30 }
 0x15d   : > { %v757_v35 = vadd.f32 %v2336_v32, %v749_v33 }
 0x15f   : > { %v758_v36 = vpack.c.bf16 %v757_v35, %v756_v34 }
 0x161   : > { %2444 = vmatmul.mubr.msk.bf16.vlgmr.msra.gmra.mrb[0].mxu0 %vm714_vm2, %v758_v36 }
 0x162   : > { %2449 = vmatprep.mubr.msk.bf16.mxu0 %vm2785_vm3, %v2784_v18 }
 0x234   : > { %v819_v38 = vpop.f32.mrb[0].mxu0 }
 0x235   : > { %v820_v39 = vadd.f32 %v2337_v37, %v819_v38  ;;  %v2445_v40 = vpop.f32.mrb[1].mxu0 }
 0x236   : > { %v822_v41 = vpop.f32.mrb[2].mxu0 }
 0x237   : > { %v3011_v42 = vpack.c.bf16 %v820_v39, %v820_v39  ;;  %v823_v43 = vadd.f32 %v2337_v37, %v822_v41  ;;  %v2446_v44 = vpop.f32.mrb[3].mxu0 }
 0x239   : > { %v3013_v45 = vpack.c.bf16 %v823_v43, %v823_v43  ;;  %830 = vrot.lane.b32.xlu0 %v3011_v42, %s2786_s30 }
 0x23b   : > { %880 = vrot.lane.b32.xlu1 %v3013_v45, %s2786_s30  ;;  %s2795_s30 = smov 104  }
 0x2ab   : > { %v831_v46 = vpop.permute.xlu0 %830 }
 0x2ac   : > { %v837_v47 = vsel %vm832_vm4, %v831_v46, 0 }
 0x2ad   : > { %2448 = vmatpush3.bf16.xpose.msra.mxu0 %v837_v47  ;;  %v881_v48 = vpop.permute.xlu1 %880 }
 0x2ae   : > { %2453 = vmatprep.subr.bf16.mxu0 %v2784_v18  ;;  %v886_v49 = vsel %vm832_vm4, %v881_v48, 0 }
 0x2b4   : > { %2450 = vmatmul.mubr.msk.bf16.vlgmr.msra.gmra.mrb[4].mxu0 %vm832_vm4, %v3011_v42 }
 0x2b5   : > { %2454 = vmatpush3.bf16.xpose.msra.mxu0 %v886_v49  ;;  %2455 = vmatprep.mubr.msk.bf16.mxu0 %vm2785_vm3, %v2784_v18 }
 0x2b6   : > { %2465 = vmatprep.subr.bf16.mxu0 %v2784_v18 }
 0x2bc   : > { %2456 = vmatmul.mubr.msk.bf16.vlgmr.msra.gmra.mrb[8].mxu0 %vm832_vm4, %v3013_v45 }
 0x2bd   : > { %2467 = vmatprep.mubr.msk.bf16.mxu0 %vm2785_vm3, %v2784_v18 }
 0x387   : > { %v873_v51 = vpop.f32.mrb[4].mxu0 }
 0x388   : > { %v874_v52 = vadd.f32 %v873_v51, %v3032_v50  ;;  %v2451_v53 = vpop.f32.mrb[5].mxu0 }
 0x389   : > { %v876_v54 = vpop.f32.mrb[6].mxu0 }
 0x38a   : > { %v2452_v55 = vpop.f32.mrb[7].mxu0  ;;  %v928_v56 = vsel %vm832_vm4, %v874_v52, -inf }
 0x38b   : > { %929 = vmax.xlane.f32.xlu1 %v928_v56 }
 0x38f   : > { %v922_v57 = vpop.f32.mrb[8].mxu0 }
 0x390   : > { %v923_v58 = vadd.f32 %v922_v57, %v3032_v50  ;;  %v2457_v59 = vpop.f32.mrb[9].mxu0 }
 0x391   : > { %v925_v60 = vpop.f32.mrb[10].mxu0 }
 0x392   : > { %v2458_v61 = vpop.f32.mrb[11].mxu0  ;;  %v931_v62 = vsel %vm832_vm4, %v923_v58, -inf }
 0x393   : > { %932 = vmax.xlane.f32.xlu0 %v931_v62 }
 0x39c   : > { %1005 = vrot.lane.b32.xlu1 %v3013_v45, %s2787_s22 }
 0x3a0   : > { %1057 = vrot.lane.b32.xlu1 %v3011_v42, %s2788_s15 }
 0x418   : > { %v930_v63 = vpop.xlane.xlu1 %929 }
 0x419   : > { %v934_v0 = vsub.f32 %v874_v52, %v930_v63 }
 0x41b   : > { %v936_v1 = vmul.f32 1.442695, %v934_v0 }
 0x41c   : > { %v1006_v2 = vpop.permute.xlu1 %1005 }
 0x41d   : > { %2655 = vpow2.f32 %v936_v1  ;;  %v1011_v5 = vsel %vm961_vm5, %v1006_v2, 0 }
 0x41e   : > { %2466 = vmatpush3.bf16.msra.mxu0 %v1011_v5 }
 0x41f   : > { %2477 = vmatprep.subr.bf16.mxu0 %v2784_v18 }
 0x420   : > { %v933_v6 = vpop.xlane.xlu0 %932  ;;  %v1058_v14 = vpop.permute.xlu1 %1057 }
 0x421   : > { %v935_v7 = vsub.f32 %v923_v58, %v933_v6  ;;  %v1063_v22 = vsel %vm832_vm4, %v1058_v14, 0 }
 0x423   : > { %v938_v8 = vmul.f32 1.442695, %v935_v7 }
 0x425   : > { %2657 = vpow2.f32 %v938_v8 }
 0x427   : > { %v2656_v9 = vpop.eup %2655 }
 0x428   : > { %v940_v10 = vsel %vm832_vm4, %v2656_v9, 0.0 }
 0x429   : > { %941 = vadd.xlane.f32.xlu0 %v940_v10 }
 0x42f   : > { %v2658_v11 = vpop.eup %2657 }
 0x430   : > { %v943_v12 = vsel %vm832_vm4, %v2658_v11, 0.0 }
 0x431   : > { %944 = vadd.xlane.f32.xlu1 %v943_v12 }
 0x43f   : > { %956 = vrot.lane.b32.xlu0 %v3011_v42, %s2787_s22  ;;  %s3354_s22 = sld [smem:[#allocation13_spill]] }
 0x442   : > { %1107 = vrot.lane.b32.xlu1 %v3013_v45, %s2788_s15  ;;  %s2799_s15 = smov 24  }
 0x443   : > { %1055 = vrot.lane.b32.xlu0 %v3011_v42, %s2789_s19 }
 0x446   : > { %1105 = vrot.lane.b32.xlu1 %v3013_v45, %s2789_s19 }
 0x4b6   : > { %v942_v13 = vpop.xlane.xlu0 %941 }
 0x4b7   : > { %2659 = vrcp.f32 %v942_v13 }
 0x4ba   : > { %v957_v15 = vpop.permute.xlu0 %956 }
 0x4bb   : > { %v963_v16 = vsel %vm961_vm5, %v957_v15, 0 }
 0x4bc   : > { %2460 = vmatpush3.bf16.msra.mxu1 %v963_v16 }
 0x4bd   : > { %2471 = vmatprep.subr.bf16.mxu1 %v2784_v18 }
 0x4be   : > { %v945_v17 = vpop.xlane.xlu1 %944  ;;  %v1056_v27 = vpop.permute.xlu0 %1055 }
 0x4bf   : > { %2661 = vrcp.f32 %v945_v17 }
 0x4c1   : > { %v2660_v19 = vpop.eup %2659 }
 0x4c2   : > { %v3050_v20 = vmul.f32 %v2660_v19, %v2656_v9  ;;  %v1108_v25 = vpop.permute.xlu1 %1107 }
 0x4c3   : > { %v1113_v28 = vsel %vm832_vm4, %v1108_v25, 0 }
 0x4c4   : > { %v954_v21 = vpack.c.bf16 %v3050_v20, %v3050_v20 }
 0x4c6   : > { %2462 = vmatmul.mubr.msk.bf16.vlgmr.msra.gmra.mrb[0].mxu1 %vm832_vm4, %v954_v21  ;;  %v1106_v29 = vpop.permute.xlu1 %1105 }
 0x4c7   : > { %2472 = vmatpush3.bf16.xpose.msra.mxu1 %v1063_v22  ;;  %2473 = vmatprep.mubr.msk.bf16.mxu1 %vm2785_vm3, %v2784_v18 }
 0x4c8   : > { %2483 = vmatprep.subr.bf16.mxu1 %v2784_v18 }
 0x4c9   : > { %v2662_v23 = vpop.eup %2661 }
 0x4ca   : > { %v3059_v24 = vmul.f32 %v2662_v23, %v2658_v11 }
 0x4cc   : > { %v955_v26 = vpack.c.bf16 %v3059_v24, %v3059_v24 }
 0x4ce   : > { %2468 = vmatmul.mubr.msk.bf16.vlgmr.msra.gmra.mrb[12].mxu0 %vm832_vm4, %v955_v26  ;;  %2474 = vmatmul.mubr.msk.bf16.vlgmr.msra.gmra.mrb[4].mxu1 %vm832_vm4, %v1056_v27 }
 0x4cf   : > { %2478 = vmatpush3.bf16.xpose.msra.mxu0 %v1113_v28  ;;  %2479 = vmatprep.mubr.msk.bf16.mxu0 %vm2785_vm3, %v2784_v18 }
 0x4d0   : > { %2489 = vmatprep.subr.bf16.mxu0 %v2784_v18  ;;  %2485 = vmatprep.mubr.msk.bf16.mxu1 %vm2785_vm3, %v2784_v18 }
 0x4d6   : > { %2480 = vmatmul.mubr.msk.bf16.vlgmr.msra.gmra.mrb[16].mxu0 %vm832_vm4, %v1106_v29 }
 0x4d7   : > { %2491 = vmatprep.mubr.msk.bf16.mxu0 %vm2785_vm3, %v2784_v18 }
 0x599   : > { %v999_v30 = vpop.f32.mrb[0].mxu1 }
 0x59a   : > { %v2463_v31 = vpop.f32.mrb[1].mxu1 }
 0x59b   : > { %v1002_v32 = vpop.f32.mrb[2].mxu1 }
 0x59c   : > { %v2464_v33 = vpop.f32.mrb[3].mxu1 }
 0x5a1   : > { %v1047_v34 = vpop.f32.mrb[12].mxu0  ;;  %v1099_v35 = vpop.f32.mrb[4].mxu1 }
 0x5a2   : > { %v1053_v36 = vpack.c.bf16 %v1047_v34, %v999_v30  ;;  %v1100_v37 = vadd.f32 %v1099_v35, %v3032_v50  ;;  %v2469_v38 = vpop.f32.mrb[13].mxu0  ;;  %v2475_v39 = vpop.f32.mrb[5].mxu1 }
 0x5a3   : > { %v1050_v40 = vpop.f32.mrb[14].mxu0  ;;  %v1102_v41 = vpop.f32.mrb[6].mxu1 }
 0x5a4   : > { %1054 = vst.msk [vmem:[#allocation2] sm:$0xff] %vm832_vm4, %v1053_v36  ;;  %v2470_v43 = vpop.f32.mrb[15].mxu0  ;;  %v2476_v44 = vpop.f32.mrb[7].mxu1  ;;  %v1155_v46 = vsel %vm832_vm4, %v1100_v37, -inf }
 0x5a5   : > { %1156 = vmax.xlane.f32.xlu0 %v1155_v46 }
 0x5a9   : > { %v1149_v47 = vpop.f32.mrb[16].mxu0 }
 0x5aa   : > { %v1150_v48 = vadd.f32 %v1149_v47, %v3032_v50  ;;  %v2481_v49 = vpop.f32.mrb[17].mxu0 }
 0x5ab   : > { %v1152_v51 = vpop.f32.mrb[18].mxu0 }
 0x5ac   : > { %v2482_v52 = vpop.f32.mrb[19].mxu0  ;;  %v1158_v53 = vsel %vm832_vm4, %v1150_v48, -inf }
 0x5ad   : > { %1159 = vmax.xlane.f32.xlu1 %v1158_v53 }
 0x5be   : > { %1231 = vrot.lane.b32.xlu1 %v3013_v45, %s2790_s20 }
 0x5c2   : > { %1288 = vrot.lane.b32.xlu1 %v3011_v42, %s2791_s26 }
 0x5c6   : > { %1338 = vrot.lane.b32.xlu1 %v3013_v45, %s2791_s26  ;;  %s3355_s26 = scalar_lea.vmem %s3325_s7, %s2908_s23 }
 0x5ca   : > { %1336 = vrot.lane.b32.xlu1 %v3013_v45, %s2792_s29 }
 0x632   : > { %v1157_v54 = vpop.xlane.xlu0 %1156 }
 0x633   : > { %v1161_v55 = vsub.f32 %v1100_v37, %v1157_v54 }
 0x635   : > { %v1163_v56 = vmul.f32 1.442695, %v1161_v55 }
 0x637   : > { %2663 = vpow2.f32 %v1163_v56 }
 0x63a   : > { %v1160_v57 = vpop.xlane.xlu1 %1159 }
 0x63b   : > { %v1162_v58 = vsub.f32 %v1150_v48, %v1160_v57 }
 0x63d   : > { %v1165_v59 = vmul.f32 1.442695, %v1162_v58 }
 0x63e   : > { %v1232_v60 = vpop.permute.xlu1 %1231 }
 0x63f   : > { %2665 = vpow2.f32 %v1165_v59  ;;  %v1237_v61 = vsel %vm961_vm5, %v1232_v60, 0 }
 0x640   : > { %2490 = vmatpush3.bf16.msra.mxu0 %v1237_v61 }
 0x641   : > { %v2664_v62 = vpop.eup %2663  ;;  %2501 = vmatprep.subr.bf16.mxu0 %v2784_v18 }
 0x642   : > { %v1167_v63 = vsel %vm832_vm4, %v2664_v62, 0.0  ;;  %v1289_v11 = vpop.permute.xlu1 %1288 }
 0x643   : > { %1168 = vadd.xlane.f32.xlu0 %v1167_v63  ;;  %v1294_v15 = vsel %vm832_vm4, %v1289_v11, 0 }
 0x646   : > { %v1339_v14 = vpop.permute.xlu1 %1338 }
 0x647   : > { %v1344_v17 = vsel %vm832_vm4, %v1339_v14, 0 }
 0x649   : > { %v2666_v0 = vpop.eup %2665 }
 0x64a   : > { %v1170_v1 = vsel %vm832_vm4, %v2666_v0, 0.0  ;;  %v1337_v21 = vpop.permute.xlu1 %1336 }
 0x64b   : > { %1171 = vadd.xlane.f32.xlu0 %v1170_v1 }
 0x661   : > { %1183 = vrot.lane.b32.xlu0 %v3011_v42, %s2790_s20 }
 0x665   : > { %1286 = vrot.lane.b32.xlu0 %v3011_v42, %s2792_s29 }
 0x6d0   : > { %v1169_v2 = vpop.xlane.xlu0 %1168 }
 0x6d1   : > { %2667 = vrcp.f32 %v1169_v2 }
 0x6d8   : > { %v1172_v5 = vpop.xlane.xlu0 %1171 }
 0x6d9   : > { %2669 = vrcp.f32 %v1172_v5 }
 0x6db   : > { %v2668_v6 = vpop.eup %2667 }
 0x6dc   : > { %v3089_v7 = vmul.f32 %v2668_v6, %v2664_v62  ;;  %v1184_v8 = vpop.permute.xlu0 %1183 }
 0x6dd   : > { %v1189_v9 = vsel %vm961_vm5, %v1184_v8, 0 }
 0x6de   : > { %2484 = vmatpush3.bf16.msra.mxu1 %v1189_v9  ;;  %v1181_v10 = vpack.c.bf16 %v3089_v7, %v3089_v7  ;;  %v1179_v1 = vadd.f32 %v3089_v7, %v3050_v20 }
 0x6df   : > { %2495 = vmatprep.subr.bf16.mxu1 %v2784_v18 }
 0x6e0   : > { %v1287_v19 = vpop.permute.xlu0 %1286 }
 0x6e1   : > { %2486 = vmatmul.mubr.msk.bf16.vlgmr.msra.gmra.mrb[8].mxu1 %vm832_vm4, %v1181_v10 }
 0x6e2   : > { %2497 = vmatprep.mubr.msk.bf16.mxu1 %vm2785_vm3, %v2784_v18 }
 0x6e3   : > { %v2670_v12 = vpop.eup %2669 }
 0x6e4   : > { %v3098_v13 = vmul.f32 %v2670_v12, %v2666_v0 }
 0x6e6   : > { %v1182_v16 = vpack.c.bf16 %v3098_v13, %v3098_v13  ;;  %v1180_v9 = vadd.f32 %v3098_v13, %v3059_v24 }
 0x6e7   : > { %2496 = vmatpush3.bf16.xpose.msra.mxu1 %v1294_v15 }
 0x6e8   : > { %2492 = vmatmul.mubr.msk.bf16.vlgmr.msra.gmra.mrb[20].mxu0 %vm832_vm4, %v1182_v16  ;;  %2507 = vmatprep.subr.bf16.mxu1 %v2784_v18 }
 0x6e9   : > { %2502 = vmatpush3.bf16.xpose.msra.mxu0 %v1344_v17  ;;  %2503 = vmatprep.mubr.msk.bf16.mxu0 %vm2785_vm3, %v2784_v18 }
 0x6ea   : > { %2513 = vmatprep.subr.bf16.mxu0 %v2784_v18 }
 0x6ee   : > { %2498 = vmatmul.mubr.msk.bf16.vlgmr.msra.gmra.mrb[12].mxu1 %vm832_vm4, %v1287_v19 }
 0x6ef   : > { %2509 = vmatprep.mubr.msk.bf16.mxu1 %vm2785_vm3, %v2784_v18 }
 0x6f0   : > { %2504 = vmatmul.mubr.msk.bf16.vlgmr.msra.gmra.mrb[24].mxu0 %vm832_vm4, %v1337_v21 }
 0x6f1   : > { %2515 = vmatprep.mubr.msk.bf16.mxu0 %vm2785_vm3, %v2784_v18 }
 0x7b4   : > { %v3115_v22 = vpop.f32.mrb[8].mxu1 }
 0x7b5   : > { %v2487_v23 = vpop.f32.mrb[9].mxu1 }
 0x7b6   : > { %v1228_v25 = vpop.f32.mrb[10].mxu1 }
 0x7b7   : > { %v2488_v26 = vpop.f32.mrb[11].mxu1 }
 0x7bb   : > { %v3117_v27 = vpop.f32.mrb[20].mxu0 }
 0x7bc   : > { %v1279_v28 = vpack.c.bf16 %v3117_v27, %v3115_v22  ;;  %v2493_v29 = vpop.f32.mrb[21].mxu0 }
 0x7bd   : > { %v1276_v30 = vpop.f32.mrb[22].mxu0 }
 0x7be   : > { %v2494_v31 = vpop.f32.mrb[23].mxu0 }
 0x7c1   : > { %v1330_v32 = vpop.f32.mrb[12].mxu1 }
 0x7c2   : > { %v1331_v33 = vadd.f32 %v1330_v32, %v3032_v50  ;;  %v2499_v34 = vpop.f32.mrb[13].mxu1 }
 0x7c3   : > { %v1333_v35 = vpop.f32.mrb[14].mxu1  ;;  %v1380_v36 = vpop.f32.mrb[24].mxu0 }
 0x7c4   : > { %v1381_v37 = vadd.f32 %v1380_v36, %v3032_v50  ;;  %v2500_v38 = vpop.f32.mrb[15].mxu1  ;;  %v2505_v39 = vpop.f32.mrb[25].mxu0  ;;  %v1386_v40 = vsel %vm832_vm4, %v1331_v33, -inf }
 0x7c5   : > { %1387 = vmax.xlane.f32.xlu0 %v1386_v40  ;;  %v1383_v41 = vpop.f32.mrb[26].mxu0 }
 0x7c6   : > { %v2506_v43 = vpop.f32.mrb[27].mxu0  ;;  %v1389_v44 = vsel %vm832_vm4, %v1381_v37, -inf }
 0x7c7   : > { %1390 = vmax.xlane.f32.xlu1 %v1389_v44 }
 0x7d8   : > { %1462 = vrot.lane.b32.xlu1 %v3013_v45, %s2793_s28 }
 0x7dc   : > { %1519 = vrot.lane.b32.xlu1 %v3011_v42, %s2794_s17 }
 0x7e0   : > { %1569 = vrot.lane.b32.xlu1 %v3013_v45, %s2794_s17 }
 0x7e4   : > { %1567 = vrot.lane.b32.xlu1 %v3013_v45, %s2795_s30 }
 0x852   : > { %v1388_v46 = vpop.xlane.xlu0 %1387 }
 0x853   : > { %v1392_v47 = vsub.f32 %v1331_v33, %v1388_v46 }
 0x854   : > { %v1391_v48 = vpop.xlane.xlu1 %1390 }
 0x855   : > { %v1394_v49 = vmul.f32 1.442695, %v1392_v47  ;;  %v1393_v51 = vsub.f32 %v1381_v37, %v1391_v48 }
 0x857   : > { %2671 = vpow2.f32 %v1394_v49  ;;  %v1396_v52 = vmul.f32 1.442695, %v1393_v51 }
 0x858   : > { %v1463_v53 = vpop.permute.xlu1 %1462 }
 0x859   : > { %2673 = vpow2.f32 %v1396_v52  ;;  %v1468_v54 = vsel %vm961_vm5, %v1463_v53, 0 }
 0x85a   : > { %2514 = vmatpush3.bf16.msra.mxu0 %v1468_v54 }
 0x85b   : > { %2525 = vmatprep.subr.bf16.mxu0 %v2784_v18 }
 0x85c   : > { %v1520_v0 = vpop.permute.xlu1 %1519 }
 0x85d   : > { %v1525_v12 = vsel %vm832_vm4, %v1520_v0, 0 }
 0x860   : > { %v1570_v11 = vpop.permute.xlu1 %1569 }
 0x861   : > { %v2672_v55 = vpop.eup %2671  ;;  %v1575_v7 = vsel %vm832_vm4, %v1570_v11, 0 }
 0x862   : > { %v1398_v56 = vsel %vm832_vm4, %v2672_v55, 0.0 }
 0x863   : > { %v2674_v57 = vpop.eup %2673  ;;  %1399 = vadd.xlane.f32.xlu0 %v1398_v56 }
 0x864   : > { %v1401_v58 = vsel %vm832_vm4, %v2674_v57, 0.0  ;;  %v1568_v13 = vpop.permute.xlu1 %1567 }
 0x867   : > { %1402 = vadd.xlane.f32.xlu0 %v1401_v58 }
 0x87d   : > { %1414 = vrot.lane.b32.xlu0 %v3011_v42, %s2793_s28 }
 0x881   : > { %1517 = vrot.lane.b32.xlu0 %v3011_v42, %s2795_s30 }
 0x8f0   : > { %v1400_v59 = vpop.xlane.xlu0 %1399 }
 0x8f1   : > { %2675 = vrcp.f32 %v1400_v59 }
 0x8f4   : > { %v1403_v60 = vpop.xlane.xlu0 %1402 }
 0x8f5   : > { %2677 = vrcp.f32 %v1403_v60 }
 0x8f8   : > { %v1415_v61 = vpop.permute.xlu0 %1414 }
 0x8f9   : > { %v1420_v62 = vsel %vm961_vm5, %v1415_v61, 0 }
 0x8fa   : > { %2508 = vmatpush3.bf16.msra.mxu1 %v1420_v62 }
 0x8fb   : > { %v2676_v63 = vpop.eup %2675  ;;  %2519 = vmatprep.subr.bf16.mxu1 %v2784_v18 }
 0x8fc   : > { %v1408_v2 = vmul.f32 %v2676_v63, %v2672_v55  ;;  %v1518_v24 = vpop.permute.xlu0 %1517 }
 0x8fe   : > { %v3139_v5 = vadd.f32 %v1408_v2, %v1179_v1  ;;  %v1412_v6 = vpack.c.bf16 %v1408_v2, %v1408_v2  ;;  %v2063_v1 = vld [vmem:[#allocation3] sm:$0x3] }
 0x8ff   : > { %v2678_v8 = vpop.eup %2677 }
 0x900   : > { %v1409_v10 = vmul.f32 %v2678_v8, %v2674_v57  ;;  %2510 = vmatmul.mubr.msk.bf16.vlgmr.msra.gmra.mrb[16].mxu1 %vm832_vm4, %v1412_v6 }
 0x901   : > { %2521 = vmatprep.mubr.msk.bf16.mxu1 %vm2785_vm3, %v2784_v18 }
 0x902   : > { %v3147_v14 = vadd.f32 %v1409_v10, %v1180_v9  ;;  %v1413_v20 = vpack.c.bf16 %v1409_v10, %v1409_v10  ;;  %v2639_v9 = vld [vmem:[%s3354_s22] sm:$0xff]   ;;  %v2640_v10 = vld [vmem:[%s3354_s22 + $0x8] sm:$0xff]  }
 0x903   : > { %2520 = vmatpush3.bf16.xpose.msra.mxu1 %v1525_v12 }
 0x904   : > { %2516 = vmatmul.mubr.msk.bf16.vlgmr.msra.gmra.mrb[28].mxu0 %vm832_vm4, %v1413_v20  ;;  %2531 = vmatprep.subr.bf16.mxu1 %v2784_v18 }
 0x905   : > { %2526 = vmatpush3.bf16.xpose.msra.mxu0 %v1575_v7  ;;  %2527 = vmatprep.mubr.msk.bf16.mxu0 %vm2785_vm3, %v2784_v18 }
 0x906   : > { %2537 = vmatprep.subr.bf16.mxu0 %v2784_v18 }
 0x90a   : > { %2522 = vmatmul.mubr.msk.bf16.vlgmr.msra.gmra.mrb[20].mxu1 %vm832_vm4, %v1518_v24 }
 0x90b   : > { %2533 = vmatprep.mubr.msk.bf16.mxu1 %vm2785_vm3, %v2784_v18 }
 0x90c   : > { %2528 = vmatmul.mubr.msk.bf16.vlgmr.msra.gmra.mrb[32].mxu0 %vm832_vm4, %v1568_v13 }
 0x90d   : > { %2539 = vmatprep.mubr.msk.bf16.mxu0 %vm2785_vm3, %v2784_v18 }
 0x9d3   : > { %v1456_v15 = vpop.f32.mrb[16].mxu1 }
 0x9d4   : > { %v2511_v16 = vpop.f32.mrb[17].mxu1 }
 0x9d5   : > { %v1459_v17 = vpop.f32.mrb[18].mxu1 }
 0x9d6   : > { %v2512_v19 = vpop.f32.mrb[19].mxu1 }
 0x9d7   : > { %v1504_v21 = vpop.f32.mrb[28].mxu0  ;;  %v2357_v19 = vld [vmem:[%s3355_s26] ss:$0 sm:$0xff] }
 0x9d8   : > { %v1510_v23 = vpack.c.bf16 %v1504_v21, %v1456_v15  ;;  %v2517_v25 = vpop.f32.mrb[29].mxu0 }
 0x9d9   : > { %v1507_v26 = vpop.f32.mrb[30].mxu0 }
 0x9da   : > { %v2518_v29 = vpop.f32.mrb[31].mxu0 }
 0x9dd   : > { %v1561_v30 = vpop.f32.mrb[20].mxu1 }
 0x9de   : > { %v1562_v31 = vadd.f32 %v1561_v30, %v3032_v50  ;;  %v2523_v32 = vpop.f32.mrb[21].mxu1 }
 0x9df   : > { %v1564_v33 = vpop.f32.mrb[22].mxu1  ;;  %v1611_v34 = vpop.f32.mrb[32].mxu0 }
 0x9e0   : > { %v1612_v35 = vadd.f32 %v1611_v34, %v3032_v50  ;;  %v2524_v36 = vpop.f32.mrb[23].mxu1  ;;  %v2529_v37 = vpop.f32.mrb[33].mxu0  ;;  %v1617_v38 = vsel %vm832_vm4, %v1562_v31, -inf }
 0x9e1   : > { %1618 = vmax.xlane.f32.xlu0 %v1617_v38  ;;  %v1614_v39 = vpop.f32.mrb[34].mxu0 }
 0x9e2   : > { %v2530_v40 = vpop.f32.mrb[35].mxu0  ;;  %v1620_v41 = vsel %vm832_vm4, %v1612_v35, -inf }
 0x9e3   : > { %1621 = vmax.xlane.f32.xlu1 %v1620_v41 }
 0x9f4   : > { %1693 = vrot.lane.b32.xlu1 %v3013_v45, %s2796_s24 }
 0x9f8   : > { %1281 = vrot.lane.b32.xlu1 %v1279_v28, %s2797_s25 }
 0x9fc   : > { %1512 = vrot.lane.b32.xlu1 %v1510_v23, %s2798_s14 }
 0xa6e   : > { %v1619_v50 = vpop.xlane.xlu0 %1618 }
 0xa6f   : > { %v1623_v43 = vsub.f32 %v1562_v31, %v1619_v50 }
 0xa70   : > { %v1622_v44 = vpop.xlane.xlu1 %1621 }
 0xa71   : > { %v1625_v46 = vmul.f32 1.442695, %v1623_v43  ;;  %v1624_v47 = vsub.f32 %v1612_v35, %v1622_v44  ;;  %v2641_v43 = vld [vmem:[%s2948_s4] sm:$0xff]   ;;  %v2642_v44 = vld [vmem:[%s2948_s4 + $0x8] sm:$0xff]  }
 0xa73   : > { %2679 = vpow2.f32 %v1625_v46  ;;  %v1627_v48 = vmul.f32 1.442695, %v1624_v47 }
 0xa74   : > { %v1694_v49 = vpop.permute.xlu1 %1693 }
 0xa75   : > { %2681 = vpow2.f32 %v1627_v48  ;;  %v1699_v45 = vsel %vm961_vm5, %v1694_v49, 0 }
 0xa76   : > { %2538 = vmatpush3.bf16.msra.mxu0 %v1699_v45 }
 0xa77   : > { %2551 = vmatprep.subr.bf16.mxu0 %v2784_v18 }
 0xa78   : > { %v1282_v22 = vpop.permute.xlu1 %1281 }
 0xa79   : > { %1285 = vst.msk [vmem:[#allocation2] sm:$0xff] %vm1284_vm6, %v1282_v22 }
 0xa7c   : > { %v1513_v27 = vpop.permute.xlu1 %1512 }
 0xa7d   : > { %v2680_v28 = vpop.eup %2679  ;;  %1516 = vst.msk [vmem:[#allocation2] sm:$0xff] %vm1515_vm7, %v1513_v27 }
 0xa7e   : > { %v1629_v51 = vsel %vm832_vm4, %v2680_v28, 0.0 }
 0xa7f   : > { %v2682_v52 = vpop.eup %2681  ;;  %1630 = vadd.xlane.f32.xlu0 %v1629_v51  ;;  %v2361_v51 = vld [vmem:[%s676_s1] ss:$0 sm:$0xff] }
 0xa80   : > { %v1632_v53 = vsel %vm832_vm4, %v2682_v52, 0.0 }
 0xa83   : > { %1633 = vadd.xlane.f32.xlu0 %v1632_v53 }
 0xa99   : > { %1645 = vrot.lane.b32.xlu0 %v3011_v42, %s2796_s24 }
 0xb0c   : > { %v1631_v54 = vpop.xlane.xlu0 %1630 }
 0xb0d   : > { %2683 = vrcp.f32 %v1631_v54 }
 0xb10   : > { %v1634_v55 = vpop.xlane.xlu0 %1633 }
 0xb11   : > { %2685 = vrcp.f32 %v1634_v55  ;;  %v2362_v55 = vld [vmem:[%s679_s21] ss:$0 sm:$0xff] }
 0xb14   : > { %v1646_v56 = vpop.permute.xlu0 %1645 }
 0xb15   : > { %v1651_v57 = vsel %vm961_vm5, %v1646_v56, 0 }
 0xb16   : > { %2532 = vmatpush3.bf16.msra.mxu1 %v1651_v57 }
 0xb17   : > { %v2684_v58 = vpop.eup %2683  ;;  %2543 = vmatprep.subr.bf16.mxu1 %v2784_v18 }
 0xb18   : > { %v1639_v59 = vmul.f32 %v2684_v58, %v2680_v28 }
 0xb1a   : > { %v1643_v60 = vpack.c.bf16 %v1639_v59, %v1639_v59  ;;  %v1641_v0 = vadd.f32 %v1639_v59, %v3139_v5 }
 0xb1b   : > { %v2686_v61 = vpop.eup %2685 }
 0xb1c   : > { %v1640_v62 = vmul.f32 %v2686_v61, %v2682_v52  ;;  %2534 = vmatmul.mubr.msk.bf16.vlgmr.msra.gmra.mrb[24].mxu1 %vm832_vm4, %v1643_v60  ;;  %v2643_v60 = vld [vmem:[%s2958_s27] sm:$0xff]   ;;  %v2644_v61 = vld [vmem:[%s2958_s27 + $0x8] sm:$0xff]  }
 0xb1d   : > { %2547 = vmatprep.mubr.msk.bf16.mxu1 %vm2785_vm3, %v2784_v18  ;;  %2544 = vmatpush3.bf16.msra.mxu1 %v2639_v9 }
 0xb1e   : > { %v1642_v42 = vadd.f32 %v1640_v62, %v3147_v14  ;;  %v1644_v63 = vpack.c.bf16 %v1640_v62, %v1640_v62  ;;  %2545 = vmatprep.subr.bf16.mxu1 %v2784_v18  ;;  %v2645_v62 = vld [vmem:[%s2958_s27 + $0x10] sm:$0xff]  }
 0xb20   : > { %v2066_v2 = vrot.slane %v1642_v42, 7  ;;  %2540 = vmatmul.mubr.msk.bf16.vlgmr.msra.gmra.mrb[36].mxu0 %vm832_vm4, %v1644_v63  ;;  %v2646_v42 = vld [vmem:[%s2958_s27 + $0x18] sm:$0xff]   ;;  %v2647_v63 = vld [vmem:[%s2958_s27 + $0x20] sm:$0xff]  }
 0xb21   : > { %2555 = vmatprep.mubr.msk.bf16.mxu0 %vm2785_vm3, %v2784_v18  ;;  %2546 = vmatpush3.bf16.msra.mxu1 %v2640_v10 }
 0xb22   : > { %v2068_v6 = vsel %vm2067_vm8, %v2066_v2, %v1641_v0  ;;  %2559 = vmatprep.subr.bf16.mxu1 %v2784_v18  ;;  %2552 = vmatpush3.bf16.msra.mxu0 %v2641_v43  ;;  %v2648_v0 = vld [vmem:[%s2958_s27 + $0x28] sm:$0xff]   ;;  %v2650_v2 = vld [vmem:[%s2958_s27 + $0x38] sm:$0xff]  }
 0xb23   : > { %v2070_v8 = vadd.f32 %v2068_v6, %v2063_v1  ;;  %2553 = vmatprep.subr.bf16.mxu0 %v2784_v18  ;;  %v2649_v1 = vld [vmem:[%s2958_s27 + $0x30] sm:$0xff]   ;;  %v2363_v6 = vld [vmem:[%s687_s6] ss:$0 sm:$0xff] }
 0xb25   : > { %2072 = vst.msk [vmem:[#allocation3] sm:$0x3] %vm2071_vm9, %v2070_v8 }
 0xb26   : > { %2554 = vmatpush3.bf16.msra.mxu0 %v2642_v44 }
 0xbef   : > { %v1687_v11 = vpop.f32.mrb[24].mxu1 }
 0xbf0   : > { %v2535_v12 = vpop.f32.mrb[25].mxu1 }
 0xbf1   : > { %v1690_v5 = vpop.f32.mrb[26].mxu1 }
 0xbf2   : > { %v2536_v14 = vpop.f32.mrb[27].mxu1 }
 0xbf3   : > { %v1735_v20 = vpop.f32.mrb[36].mxu0 }
 0xbf4   : > { %v1741_v7 = vpack.c.bf16 %v1735_v20, %v1687_v11  ;;  %v2541_v24 = vpop.f32.mrb[37].mxu0 }
 0xbf5   : > { %v1738_v13 = vpop.f32.mrb[38].mxu0 }
 0xbf6   : > { %1743 = vrot.lane.b32.xlu0 %v1741_v7, %s2799_s15  ;;  %v2542_v15 = vpop.f32.mrb[39].mxu0 }
 0xc68   : > { %v1744_v16 = vpop.permute.xlu0 %1743 }
 0xc69   : > { %1747 = vst.msk [vmem:[#allocation2] sm:$0xff] %vm1746_vm10, %v1744_v16 }
 0xc70   : > { %v1748_v17 = vld [vmem:[#allocation2] sm:$0xff] }
 0xc71   : > { %2548 = vmatmul.mubr.msk.bf16.vlgmr.msra.gmra.mrb[28].mxu1 %vm714_vm2, %v1748_v17 }
 0xc72   : > { %2575 = vmatprep.mubr.msk.bf16.mxu1 %vm2785_vm3, %v2784_v18  ;;  %2560 = vmatpush3.bf16.msra.mxu1 %v2643_v60 }
 0xc73   : > { %2561 = vmatprep.subr.bf16.mxu1 %v2784_v18 }
 0xc76   : > { %2562 = vmatpush3.bf16.msra.mxu1 %v2644_v61 }
 0xc77   : > { %2563 = vmatprep.subr.bf16.mxu1 %v2784_v18 }
 0xc7a   : > { %2564 = vmatpush3.bf16.msra.mxu1 %v2645_v62 }
 0xc7b   : > { %2565 = vmatprep.subr.bf16.mxu1 %v2784_v18 }
 0xc7e   : > { %2566 = vmatpush3.bf16.msra.mxu1 %v2646_v42 }
 0xc7f   : > { %2567 = vmatprep.subr.bf16.mxu1 %v2784_v18 }
 0xc82   : > { %2568 = vmatpush3.bf16.msra.mxu1 %v2647_v63 }
 0xc83   : > { %2569 = vmatprep.subr.bf16.mxu1 %v2784_v18 }
 0xc86   : > { %2570 = vmatpush3.bf16.msra.mxu1 %v2648_v0 }
 0xc87   : > { %2571 = vmatprep.subr.bf16.mxu1 %v2784_v18 }
 0xc8a   : > { %2572 = vmatpush3.bf16.msra.mxu1 %v2649_v1 }
 0xc8b   : > { %2573 = vmatprep.subr.bf16.mxu1 %v2784_v18 }
 0xc8e   : > { %2574 = vmatpush3.bf16.msra.mxu1 %v2650_v2 }
 0xd44   : > { %v1809_v21 = vpop.f32.mrb[28].mxu1 }
 0xd45   : > { %v1810_v23 = vadd.f32 %v2357_v19, %v1809_v21  ;;  %v2549_v25 = vpop.f32.mrb[29].mxu1 }
 0xd46   : > { %v1812_v26 = vpop.f32.mrb[30].mxu1 }
 0xd47   : > { %v3199_v29 = vadd.f32 %v1810_v23, %v2971_v3  ;;  %v1813_v30 = vadd.f32 %v2357_v19, %v1812_v26  ;;  %v2550_v31 = vpop.f32.mrb[31].mxu1  ;;  %v2369_v26 = vld [vmem:[%s695_s16] ss:$0 sm:$0xff] }
 0xd49   : > { %v3202_v32 = vadd.f32 %v1813_v30, %v2973_v4  ;;  %v1820_v33 = vsel %vm714_vm2, %v3199_v29, 0.0 }
 0xd4a   : > { %1821 = vadd.xlane.f32.xlu1 %v1820_v33 }
 0xd4b   : > { %v1823_v34 = vsel %vm714_vm2, %v3202_v32, 0.0 }
 0xd4c   : > { %1824 = vadd.xlane.f32.xlu0 %v1823_v34 }
 0xdd7   : > { %v1822_v35 = vpop.xlane.xlu1 %1821 }
 0xdd8   : > { %v1826_v36 = vmul.f32 0.03125, %v1822_v35 }
 0xdd9   : > { %v1825_v37 = vpop.xlane.xlu0 %1824 }
 0xdda   : > { %v1828_v3 = vsub.f32 %v3199_v29, %v1826_v36  ;;  %v1827_v38 = vmul.f32 0.03125, %v1825_v37 }
 0xddc   : > { %v1829_v39 = vsub.f32 %v3202_v32, %v1827_v38  ;;  %v1830_v4 = vmul.f32 %v1828_v3, %v1828_v3  ;;  %v2077_v38 = vld [vmem:[#allocation3] sm:$0x3] (!%p2378_p6) }
 0xdde   : > { %v1832_v40 = vsel %vm714_vm2, %v1830_v4, 0.0  ;;  %v1831_v41 = vmul.f32 %v1829_v39, %v1829_v39  ;;  %v2800_v4 = vmov (!%p2378_p6), 1966171168  }
 0xddf   : > { %1833 = vadd.xlane.f32.xlu0 %v1832_v40  ;;  %v2081_v40 = vunpack.c.l.s4 (!%p2378_p6), %v2800_v4 }
 0xde0   : > { %v1835_v50 = vsel %vm714_vm2, %v1831_v41, 0.0 }
 0xde1   : > { %v2082_v43 = vunpack.c.0.s8 (!%p2378_p6), %v2081_v40 }
 0xde3   : > { %1836 = vadd.xlane.f32.xlu0 %v1835_v50  ;;  %v2078_v50 = vmul.f32 (!%p2378_p6), 0.125, %v2077_v38 }
 0xe6c   : > { %v1834_v46 = vpop.xlane.xlu0 %1833 }
 0xe6d   : > { %v1838_v47 = vmul.f32 0.03125, %v1834_v46 }
 0xe6f   : > { %v1840_v48 = vadd.f32 1e-05, %v1838_v47 }
 0xe70   : > { %v1837_v49 = vpop.xlane.xlu0 %1836 }
 0xe71   : > { %2687 = vrsqrt.f32 %v1840_v48  ;;  %v1839_v45 = vmul.f32 0.03125, %v1837_v49 }
 0xe73   : > { %v1841_v22 = vadd.f32 1e-05, %v1839_v45 }
 0xe75   : > { %2689 = vrsqrt.f32 %v1841_v22 }
 0xe7b   : > { %v2688_v27 = vpop.eup %2687 }
 0xe7c   : > { %v1844_v28 = vmul.f32 %v2688_v27, %v1828_v3 }
 0xe7e   : > { %v1852_v53 = vmul.f32 %v2361_v51, %v1844_v28 }
 0xe7f   : > { %v2690_v52 = vpop.eup %2689 }
 0xe80   : > { %v1845_v54 = vmul.f32 %v2690_v52, %v1829_v39  ;;  %v1860_v57 = vadd.f32 %v2362_v55, %v1852_v53  ;;  %v2083_v39 = vlaneseq (!%p2378_p6) }
 0xe82   : > { %v1853_v56 = vmul.f32 %v2361_v51, %v1845_v54  ;;  %v2084_v41 = vshrl.u32 (!%p2378_p6), %v2083_v39, 7 }
 0xe84   : > { %v1861_v58 = vadd.f32 %v2362_v55, %v1853_v56  ;;  %v2085_v44 = vsub.s32 (!%p2378_p6), %v2082_v43, %v2084_v41 }
 0xe86   : > { %v1862_v59 = vpack.c.bf16 %v1861_v58, %v1860_v57 }
 0xe88   : > { %2556 = vmatmul.mubr.msk.bf16.vlgmr.msra.gmra.mrb[40].mxu0 %vm714_vm2, %v1862_v59 }
 0xf5b   : > { %v1923_v8 = vpop.f32.mrb[40].mxu0 }
 0xf5c   : > { %v1924_v9 = vadd.f32 %v2363_v6, %v1923_v8  ;;  %v2557_v10 = vpop.f32.mrb[41].mxu0 }
 0xf5d   : > { %v1926_v11 = vpop.f32.mrb[42].mxu0 }
 0xf5e   : > { %v2367_v12 = vmul.f32 -1.702, %v1924_v9  ;;  %v1927_v5 = vadd.f32 %v2363_v6, %v1926_v11  ;;  %v2558_v14 = vpop.f32.mrb[43].mxu0 }
 0xf60   : > { %v1934_v20 = vmul.f32 1.442695, %v2367_v12  ;;  %v2368_v7 = vmul.f32 -1.702, %v1927_v5 }
 0xf62   : > { %2691 = vpow2.f32 %v1934_v20  ;;  %v1936_v24 = vmul.f32 1.442695, %v2368_v7 }
 0xf64   : > { %2693 = vpow2.f32 %v1936_v24 }
 0xf6c   : > { %v2692_v18 = vpop.eup %2691 }
 0xf6d   : > { %v1938_v13 = vadd.f32 1.0, %v2692_v18 }
 0xf6e   : > { %v2694_v15 = vpop.eup %2693 }
 0xf6f   : > { %2695 = vrcp.f32 %v1938_v13  ;;  %v1939_v16 = vadd.f32 1.0, %v2694_v15 }
 0xf71   : > { %2697 = vrcp.f32 %v1939_v16 }
 0xf79   : > { %v2696_v17 = vpop.eup %2695 }
 0xf7a   : > { %v1944_v21 = vmul.f32 %v2696_v17, %v1924_v9 }
 0xf7b   : > { %v2698_v19 = vpop.eup %2697 }
 0xf7c   : > { %v1945_v23 = vmul.f32 %v2698_v19, %v1927_v5 }
 0xf7e   : > { %v1946_v25 = vpack.c.bf16 %v1945_v23, %v1944_v21 }
 0xf80   : > { %2576 = vmatmul.mubr.bf16.vlgmr.msra.gmra.mrb[32].mxu1 %v1946_v25 }
0x1053   : > { %v2052_v30 = vpop.f32.mrb[32].mxu1 }
0x1054   : > { %v2053_v31 = vadd.f32 %v2369_v26, %v2052_v30  ;;  %v2577_v33 = vpop.f32.mrb[33].mxu1  ;;  %2076 = sbr.rel (%p2378_p6) target bundleno = 4189 (0x105d), region = 84 }
0x1055   : > { %v2055_v34 = vpop.f32.mrb[34].mxu1 }
0x1056   : > { %v2059_v35 = vadd.f32 %v2053_v31, %v3199_v29  ;;  %v2056_v36 = vadd.f32 %v2369_v26, %v2055_v34  ;;  %v2578_v37 = vpop.f32.mrb[35].mxu1  ;;  %v2086_v29 = vrot.slane (!%p2378_p6), %v2078_v50, %v2085_v44 }
0x1058   : > { %2061 = vst.msk [vmem:[#allocation4] sm:$0xff] %vm714_vm2, %v2059_v35  ;;  %v2060_v3 = vadd.f32 %v2056_v36, %v3202_v32  ;;  %v2094_v46 = vrot.slane (!%p2378_p6), %v2086_v29, %v2085_v44  ;;  %v2087_v47 = vcombine.high (!%p2378_p6), %v2086_v29, %v2086_v29 }
0x105a   : > { %2062 = vst.msk [vmem:[#allocation4 + $0x8] sm:$0xff] %vm714_vm2, %v2060_v3  ;;  %v2101_v48 = vrot.slane (!%p2378_p6), %v2087_v47, %v2085_v44 }
0x105b   : > { %2105 = vst.msk [vmem:[#allocation6] sm:$0x1] %vm2104_vm11, %v2094_v46 }
0x105c   : > { %2106 = vst.msk [vmem:[#allocation6 + $0x1] sm:$0x1] %vm2104_vm11, %v2101_v48 }
0x105d PF: > { %s3356_s23 = sld [smem:[#allocation11_spill]]  ;;  %s2801_s30 = smov [#allocation4]  }
0x105e   : > { %s2116_s24 = sshll.u32 %s2801_s30, 4  ;;  %s2802_s22 = smov [#allocation6]   ;;  %s2117_s24 = int_to_ptr.vmem [resolvable:$true] %s2116_s24 }
0x105f   : > { %s2132_s15 = sshll.u32 %s2802_s22, 4  ;;  %s2699_s19 = scalar_lea.vmem %s2117_s24, 256  ;;  %s2133_s15 = int_to_ptr.vmem [resolvable:$true] %s2132_s15 }
0x1060   : > { %p2700_p8 = scmp.ne.s32.totalorder %s2117_s24, %s2699_s19  ;;  %p2706_p11 = scmp.lt.s32.totalorder %s2117_s24, %s2117_s24 }
0x1061   : > { %p2707_p12 = scmp.lt.s32.totalorder %s2699_s19, %s2699_s19 }
0x1063   : > { %s3357_s16 = sadd.s32 4294967295, %s3356_s23   ;;  %p2708_p13 = por %p2707_p12, %p2706_p11 }
0x1064   : > { %p3258_p7 = scmp.eq.s32.totalorder %s3357_s16, 1 }
0x1066   : > { %p2701_p9 = pnand %p2700_p8, %p3258_p7 }
0x1068   : > { %p2702_p10 = pneg %p2701_p9 }
0x106a   : > { %p2709_p0 = pnand %p2708_p13, %p2702_p10 }
0x106c   : > { %2712 = shalt.err (!%p2709_p0)
}
0x106d   : > { %s3359_s29 = sld [smem:[#allocation17_spill]] }
0x1073   : > { %s2713_s28 = scalar_lea.hbm %s3359_s29, 256 }
0x1074   : > { %p2714_p1 = scmp.ne.s32.totalorder %s3359_s29, %s2713_s28  ;;  %p2719_p4 = scmp.lt.u32.totalorder %s2713_s28, %s3359_s29 }
0x1076   : > { %p2715_p2 = pnand %p2714_p1, %p3258_p7 }
0x1078   : > { %p2716_p3 = pneg %p2715_p2 }
0x107a   : > { %p2721_p5 = pnand %p2719_p4, %p2716_p3 }
0x107c   : > { %2724 = shalt.err (!%p2721_p5)
}
0x107d   : > { %s2803_s6 = smov 128   ;;  %s2725_s16 = scalar_lea.vmem %s2133_s15, 32 }
0x107e   : > { %2580 = dma.vmem_to_hbm [thread:$0]  (%p3258_p7), %s2117_s24, 256, %s3359_s29, [#allocation5], %s2803_s6, %s2803_s6, %s2797_s25  }
0x107f   : > { %p2726_p6 = scmp.ne.s32.totalorder %s2133_s15, %s2725_s16  ;;  %p2732_p10 = scmp.lt.s32.totalorder %s2133_s15, %s2133_s15 }
0x1080   : > { %p2733_p11 = scmp.lt.s32.totalorder %s2725_s16, %s2725_s16 }
0x1081   : > { %p2727_p8 = pnand %p2726_p6, %p3258_p7 }
0x1082   : > { %p2734_p12 = por %p2733_p11, %p2732_p10 }
0x1083   : > { %p2728_p9 = pneg %p2727_p8 }
0x1085   : > { %p2735_p13 = pnand %p2734_p12, %p2728_p9 }
0x1087   : > { %2738 = shalt.err (!%p2735_p13)
}
0x1088   : > { %s3360_s19 = sld [smem:[#allocation18_spill]] }
0x108e   : > { %s3361_s26 = smov %s3360_s19  ;;  %s2739_s20 = scalar_lea.hbm %s3360_s19, 32 }
0x108f   : > { %p2740_p0 = scmp.ne.s32.totalorder %s3361_s26, %s2739_s20  ;;  %p2745_p3 = scmp.lt.u32.totalorder %s2739_s20, %s3361_s26 }
0x1091   : > { %p2741_p1 = pnand %p2740_p0, %p3258_p7 }
0x1093   : > { %p2742_p2 = pneg %p2741_p1 }
0x1095   : > { %p2747_p4 = pnand %p2745_p3, %p2742_p2 }
0x1097   : > { %2750 = shalt.err (!%p2747_p4)
}
0x1098   : > { %s2804_s17 = smov 1  }
0x1099   : > { %2582 = dma.vmem_to_hbm [thread:$0]  (%p3258_p7), %s2133_s15, 32, %s3361_s26, [#allocation7], %s2798_s14, %s2798_s14, %s2804_s17  }
0x109a   : > { %2764 = dma.done.wait (%p3258_p7), [#allocation5], 256  }
0x109b   : > { %2766 = vsyncadd (%p3258_p7), [#allocation5], 4294967040 }
0x109c   : > { %2768 = dma.done.wait (%p3258_p7), [#allocation7], 32  }
0x109d   : > { %2770 = vsyncadd (%p3258_p7), [#allocation7], 4294967264 }
0x109e PF: > { %s3362_s6 = sld [smem:[#allocation11_spill]]  ;;  %s3363_s18 = sld [smem:[#allocation10_spill]] }
0x109f   : > { %s3364_s19 = sld [smem:[#allocation12_spill]] }
0x10a4   : > { %s28_s20 = sadd.s32 1, %s3362_s6  }
0x10a5   : > { %p25_p5 = scmp.ge.s32.totalorder %s28_s20, 4  }
0x10a7   :  { %27 = sbr.rel (!%p25_p5) target bundleno = 9 (0x9), region = 157 }
0x10ae   :  { %2152 = vsyncpa [#allocation5], 1 }
0x10af   :  { %2154 = vsyncpa [#allocation5 + $0x1], 1 }
0x10b0   :  { %2155 = vsyncpa [#allocation7], 1 }

</bundles_post_ra>
